<compile_context>
chip_gen: v7x
topology: tpu7x:2x2x1
jax: 0.10.0
libtpu: 0.0.40
codegen_flags: <defaults>
</compile_context>

<pallas_src>
import functools
import math

import jax
import jax.numpy as jnp
from jax import lax
from jax.experimental import pallas as pl
from jax.experimental.pallas import tpu as pltpu


def attention_kernel(x_ref, mask_ref, wqkv_ref, bqkv_ref, wo_ref, bo_ref,
                     gamma_ref, beta_ref, out_ref, *,
                     num_heads: int, head_dim: int, hidden: int,
                     block_b: int, eps: float):
    # Constant operands (bf16 for matmul weights, f32 for the rest).
    w_qkv = wqkv_ref[...]                       # (H, 3H) bf16, scale folded into Q part
    b_qkv = bqkv_ref[...].astype(jnp.float32)   # (1, 3H)
    bo = bo_ref[...].astype(jnp.float32)        # (1, H)
    gamma = gamma_ref[...].astype(jnp.float32)  # (1, H)
    beta = beta_ref[...].astype(jnp.float32)    # (1, H)
    mm_dtype = w_qkv.dtype

    bb = block_b
    S = x_ref.shape[1]
    BS = bb * S

    # Residual path in f32, flattened to one lane-dense slab for the block.
    x_all = x_ref[...].astype(jnp.float32).reshape(BS, hidden)      # (bb*S, H)

    # Fused QKV projection for the whole block: one MXU pass, N = 3H.
    qkv = jnp.dot(x_all.astype(mm_dtype), w_qkv,
                  preferred_element_type=jnp.float32) + b_qkv        # (bb*S, 3H) f32
    qkv_mm = qkv.astype(mm_dtype)                                     # bf16 operands

    dense_rows = []
    for bi in range(bb):
        # Additive key mask, broadcast once (hoisted out of the head loop).
        mask_row = mask_ref[bi, 0].astype(jnp.float32)                # (1, S)
        mask2d = jnp.broadcast_to(mask_row, (S, S))                   # (S, S)

        r0 = bi * S
        # Accumulate the output-projection result head by head into one
        # lane-dense (S, H) f32 buffer (no concatenate over lanes needed).
        dense = jnp.zeros((S, hidden), jnp.float32)
        for h in range(num_heads):
            lo = h * head_dim
            q_h = qkv_mm[r0:r0 + S, lo:lo + head_dim]                          # (S, d)
            k_h = qkv_mm[r0:r0 + S, hidden + lo:hidden + lo + head_dim]        # (S, d)
            v_h = qkv_mm[r0:r0 + S, 2 * hidden + lo:2 * hidden + lo + head_dim]

            # scores = q_h @ k_h^T without an explicit transpose.
            s = lax.dot_general(q_h, k_h, (((1,), (1,)), ((), ())),
                                preferred_element_type=jnp.float32)
            s = s + mask2d

            # softmax over keys (f32), EUP reciprocal for the normalization.
            m = jnp.max(s, axis=-1, keepdims=True)
            e = jnp.exp(s - m)
            denom = jnp.sum(e, axis=-1, keepdims=True)
            p = e * pl.reciprocal(denom, approx=True)

            ctx = jnp.dot(p.astype(mm_dtype), v_h,
                          preferred_element_type=jnp.float32)                  # (S, d)
            dense = dense + jnp.dot(ctx.astype(mm_dtype), wo_ref[h],
                                    preferred_element_type=jnp.float32)        # (S, H)
        dense_rows.append(dense)

    dense_all = dense_rows[0] if bb == 1 else jnp.concatenate(dense_rows, axis=0)

    # SelfOutput on the whole block: +bias, +residual, LayerNorm (all f32).
    y = dense_all + bo + x_all
    u = jnp.mean(y, axis=-1, keepdims=True)
    var = jnp.mean((y - u) * (y - u), axis=-1, keepdims=True)
    y_norm = (y - u) * lax.rsqrt(var + eps)
    out = gamma * y_norm + beta
    out_ref[...] = out.reshape(bb, S, hidden).astype(out_ref.dtype)


def _pick_block_b(B, S, H):
    """Largest divisor of B whose activation slab stays under ~2 MiB."""
    budget = 2 * 1024 * 1024
    bb = max(1, min(B, budget // max(1, S * H * 4)))
    while B % bb:
        bb -= 1
    return bb


def attention_forward(x, attention_mask, params, *, num_heads: int,
                      eps: float = 1e-12, block_b: int | None = None,
                      mm_dtype=jnp.bfloat16):
    B, S, H = x.shape
    assert H % num_heads == 0
    d = H // num_heads
    scale = 1.0 / math.sqrt(d)

    if block_b is None:
        block_b = _pick_block_b(B, S, H)
    assert B % block_b == 0

    # ---- Host-side weight preparation (done once per call / under jit) ----
    # nn.Linear stores W as (out, in); pre-transpose to (in, out) and fuse QKV.
    wq_t = params["wq"].T.astype(jnp.float32) * scale   # fold 1/sqrt(d) into Q
    wk_t = params["wk"].T.astype(jnp.float32)
    wv_t = params["wv"].T.astype(jnp.float32)
    w_qkv = jnp.concatenate([wq_t, wk_t, wv_t], axis=1).astype(mm_dtype)   # (H, 3H)
    b_qkv = jnp.concatenate([params["bq"].astype(jnp.float32) * scale,
                             params["bk"].astype(jnp.float32),
                             params["bv"].astype(jnp.float32)])[None, :]    # (1, 3H)
    # Output dense: context @ wo.T == sum_h ctx_h @ wo.T[h*d:(h+1)*d, :]
    wo_split = params["wo"].T.reshape(num_heads, d, H).astype(mm_dtype)    # (nh, d, H)
    bo = params["bo"].astype(jnp.float32)[None, :]                          # (1, H)
    gamma = params["gamma"].astype(jnp.float32)[None, :]
    beta = params["beta"].astype(jnp.float32)[None, :]

    kernel = functools.partial(attention_kernel, num_heads=num_heads,
                               head_dim=d, hidden=H, block_b=block_b, eps=eps)

    def const_spec(arr):
        n = arr.ndim
        return pl.BlockSpec(arr.shape, lambda b, _n=n: (0,) * _n)

    # VMEM budget: double-buffered blocks + generous headroom, clamped to a
    # range that is safe on v5e/v6e (128 MiB) and v7x (64 MiB physical).
    block_bytes = (2 * block_b * S * H * 4          # x block + out block (f32)
                   + block_b * S * 4                # mask block
                   + w_qkv.size * 2 + wo_split.size * 2
                   + (b_qkv.size + bo.size + gamma.size + beta.size) * 4)
    vmem_limit = int(min(64 << 20, max(32 << 20, 2 * block_bytes + (16 << 20))))

    return pl.pallas_call(
        kernel,
        out_shape=jax.ShapeDtypeStruct((B, S, H), x.dtype),
        grid_spec=pltpu.PrefetchScalarGridSpec(
            num_scalar_prefetch=0,
            grid=(B // block_b,),
            in_specs=[
                pl.BlockSpec((block_b, S, H), lambda b: (b, 0, 0)),        # x
                pl.BlockSpec((block_b, 1, 1, S), lambda b: (b, 0, 0, 0)),  # mask
                const_spec(w_qkv), const_spec(b_qkv),
                const_spec(wo_split), const_spec(bo),
                const_spec(gamma), const_spec(beta),
            ],
            out_specs=pl.BlockSpec((block_b, S, H), lambda b: (b, 0, 0)),
        ),
        compiler_params=pltpu.CompilerParams(
            dimension_semantics=("parallel",),
            vmem_limit_bytes=vmem_limit),
    )(x, attention_mask, w_qkv, b_qkv, wo_split, bo, gamma, beta)


def reference_forward(x, attention_mask, params, *, num_heads: int,
                      eps: float = 1e-12):
    """Pure-JAX f32 reference mirroring the PyTorch forward (dropout = identity)."""
    B, S, H = x.shape
    d = H // num_heads
    q = x @ params["wq"].T + params["bq"]
    k = x @ params["wk"].T + params["bk"]
    v = x @ params["wv"].T + params["bv"]
    to_heads = lambda t: t.reshape(B, S, num_heads, d).transpose(0, 2, 1, 3)
    q, k, v = to_heads(q), to_heads(k), to_heads(v)
    scores = jnp.einsum("bhqd,bhkd->bhqk", q, k) / math.sqrt(d)
    scores = scores + attention_mask
    probs = jax.nn.softmax(scores, axis=-1)
    ctx = jnp.einsum("bhqk,bhkd->bhqd", probs, v)
    ctx = ctx.transpose(0, 2, 1, 3).reshape(B, S, H)
    y = ctx @ params["wo"].T + params["bo"] + x
    u = y.mean(-1, keepdims=True)
    s = ((y - u) ** 2).mean(-1, keepdims=True)
    return params["gamma"] * ((y - u) / jnp.sqrt(s + eps)) + params["beta"]


def init_params(key, hidden_size):
    ks = jax.random.split(key, 8)
    scale = 0.02
    return {
        "wq": scale * jax.random.normal(ks[0], (hidden_size, hidden_size), jnp.float32),
        "bq": scale * jax.random.normal(ks[1], (hidden_size,), jnp.float32),
        "wk": scale * jax.random.normal(ks[2], (hidden_size, hidden_size), jnp.float32),
        "bk": scale * jax.random.normal(ks[3], (hidden_size,), jnp.float32),
        "wv": scale * jax.random.normal(ks[4], (hidden_size, hidden_size), jnp.float32),
        "bv": scale * jax.random.normal(ks[5], (hidden_size,), jnp.float32),
        "wo": scale * jax.random.normal(ks[6], (hidden_size, hidden_size), jnp.float32),
        "bo": scale * jax.random.normal(ks[7], (hidden_size,), jnp.float32),
        "gamma": jnp.ones((hidden_size,), jnp.float32),
        "beta": jnp.zeros((hidden_size,), jnp.float32),
    }


if __name__ == "__main__":
    B, S, H, NUM_HEADS = 2, 8, 32, 4

    key = jax.random.PRNGKey(0)
    k_x, k_m, k_p = jax.random.split(key, 3)

    x = jax.random.normal(k_x, (B, S, H), jnp.float32)
    # BERT-style additive mask: 0 for attend, -10000 for masked positions.
    keep = (jax.random.uniform(k_m, (B, 1, 1, S)) > 0.2).astype(jnp.float32)
    attention_mask = (1.0 - keep) * -10000.0

    params = init_params(k_p, H)

    out = attention_forward(x, attention_mask, params, num_heads=NUM_HEADS)
    out = jax.block_until_ready(out)

    ref = reference_forward(x, attention_mask, params, num_heads=NUM_HEADS)
    # bf16 MXU operands + approx reciprocal -> relax tolerance vs. the pure-f32
    # reference (mixed-precision error is ~1e-3 absolute at these scales).
    assert jnp.allclose(out, ref, atol=1e-2, rtol=1e-2), "mismatch vs reference"

    print("KERNEL_OK")
</pallas_src>

<mosaic_0001>
module attributes {stable_mosaic.version = 11 : i64} {
  func.func @attention_kernel(%arg0: i32, %arg1: memref<2x8x32xf32, #tpu.memory_space<vmem>>, %arg2: memref<2x1x1x8xf32, #tpu.memory_space<vmem>>, %arg3: memref<32x96xbf16, #tpu.memory_space<vmem>>, %arg4: memref<1x96xf32, #tpu.memory_space<vmem>>, %arg5: memref<4x8x32xbf16, #tpu.memory_space<vmem>>, %arg6: memref<1x32xf32, #tpu.memory_space<vmem>>, %arg7: memref<1x32xf32, #tpu.memory_space<vmem>>, %arg8: memref<1x32xf32, #tpu.memory_space<vmem>>, %arg9: memref<2x8x32xf32, #tpu.memory_space<vmem>>) attributes {dimension_semantics = [#tpu.dimension_semantics<parallel>], iteration_bounds = array<i64: 1>, scalar_prefetch = 0 : i64, scratch_operands = 0 : i64, tpu.core_type = #tpu.core_type<tc>, window_params = [{transform_indices = @transform_0, window_bounds = array<i64: 2, 8, 32>}, {transform_indices = @transform_1, window_bounds = array<i64: 2, 1, 1, 8>}, {pipeline_mode = #tpu.pipeline_mode<synchronous>, transform_indices = @transform_2, window_bounds = array<i64: 32, 96>}, {pipeline_mode = #tpu.pipeline_mode<synchronous>, transform_indices = @transform_3, window_bounds = array<i64: 1, 96>}, {pipeline_mode = #tpu.pipeline_mode<synchronous>, transform_indices = @transform_4, window_bounds = array<i64: 4, 8, 32>}, {pipeline_mode = #tpu.pipeline_mode<synchronous>, transform_indices = @transform_5, window_bounds = array<i64: 1, 32>}, {pipeline_mode = #tpu.pipeline_mode<synchronous>, transform_indices = @transform_6, window_bounds = array<i64: 1, 32>}, {pipeline_mode = #tpu.pipeline_mode<synchronous>, transform_indices = @transform_7, window_bounds = array<i64: 1, 32>}, {transform_indices = @transform_8, window_bounds = array<i64: 2, 8, 32>}]} {
    %c0 = arith.constant 0 : index
    %c0_0 = arith.constant 0 : index
    %0 = vector.load %arg3[%c0, %c0_0] : memref<32x96xbf16, #tpu.memory_space<vmem>>, vector<32x96xbf16>
    %c0_1 = arith.constant 0 : index
    %c0_2 = arith.constant 0 : index
    %1 = vector.load %arg4[%c0_1, %c0_2] : memref<1x96xf32, #tpu.memory_space<vmem>>, vector<1x96xf32>
    %c0_3 = arith.constant 0 : index
    %c0_4 = arith.constant 0 : index
    %2 = vector.load %arg6[%c0_3, %c0_4] : memref<1x32xf32, #tpu.memory_space<vmem>>, vector<1x32xf32>
    %c0_5 = arith.constant 0 : index
    %c0_6 = arith.constant 0 : index
    %3 = vector.load %arg7[%c0_5, %c0_6] : memref<1x32xf32, #tpu.memory_space<vmem>>, vector<1x32xf32>
    %c0_7 = arith.constant 0 : index
    %c0_8 = arith.constant 0 : index
    %4 = vector.load %arg8[%c0_7, %c0_8] : memref<1x32xf32, #tpu.memory_space<vmem>>, vector<1x32xf32>
    %c0_9 = arith.constant 0 : index
    %c0_10 = arith.constant 0 : index
    %c0_11 = arith.constant 0 : index
    %5 = vector.load %arg1[%c0_9, %c0_10, %c0_11] : memref<2x8x32xf32, #tpu.memory_space<vmem>>, vector<2x8x32xf32>
    %6 = vector.shape_cast %5 : vector<2x8x32xf32> to vector<16x32xf32>
    %7 = arith.truncf %6 : vector<16x32xf32> to vector<16x32xbf16>
    %cst = arith.constant dense<0.000000e+00> : vector<16x96xf32>
    %8 = tpu.matmul %7, %0, %cst {dimension_numbers = #tpu.dot_dimension_numbers<[1], [0], [0], [1], [0, 0, 1, 1], [], []>} : vector<16x32xbf16>, vector<32x96xbf16>, vector<16x96xf32> -> vector<16x96xf32>
    %9 = vector.broadcast %1 : vector<1x96xf32> to vector<16x96xf32>
    %10 = arith.addf %8, %9 : vector<16x96xf32>
    %11 = arith.truncf %10 : vector<16x96xf32> to vector<16x96xbf16>
    %c0_12 = arith.constant 0 : index
    %c0_13 = arith.constant 0 : index
    %c0_14 = arith.constant 0 : index
    %c0_15 = arith.constant 0 : index
    %12 = vector.load %arg2[%c0_12, %c0_13, %c0_14, %c0_15] : memref<2x1x1x8xf32, #tpu.memory_space<vmem>>, vector<1x1x1x8xf32>
    %13 = vector.shape_cast %12 : vector<1x1x1x8xf32> to vector<1x8xf32>
    %14 = vector.shape_cast %13 : vector<1x8xf32> to vector<1x8xf32>
    %15 = vector.broadcast %14 : vector<1x8xf32> to vector<8x8xf32>
    %cst_16 = arith.constant 0.000000e+00 : f32
    %16 = vector.broadcast %cst_16 : f32 to vector<8x32xf32>
    %17 = vector.extract_strided_slice %11 {offsets = [0, 0], sizes = [8, 8], strides = [1, 1]} : vector<16x96xbf16> to vector<8x8xbf16>
    %18 = vector.extract_strided_slice %11 {offsets = [0, 32], sizes = [8, 8], strides = [1, 1]} : vector<16x96xbf16> to vector<8x8xbf16>
    %19 = vector.extract_strided_slice %11 {offsets = [0, 64], sizes = [8, 8], strides = [1, 1]} : vector<16x96xbf16> to vector<8x8xbf16>
    %cst_17 = arith.constant dense<0.000000e+00> : vector<8x8xf32>
    %20 = tpu.matmul %17, %18, %cst_17 {dimension_numbers = #tpu.dot_dimension_numbers<[1], [1], [0], [0], [0, 0, 1, 0], [], []>} : vector<8x8xbf16>, vector<8x8xbf16>, vector<8x8xf32> -> vector<8x8xf32>
    %21 = arith.addf %20, %15 : vector<8x8xf32>
    %cst_18 = arith.constant dense<0xFF800000> : vector<8xf32>
    %22 = vector.multi_reduction <maximumf>, %21, %cst_18 [1] : vector<8x8xf32> to vector<8xf32>
    %23 = vector.shape_cast %22 : vector<8xf32> to vector<8x1xf32>
    %24 = vector.broadcast %23 : vector<8x1xf32> to vector<8x8xf32>
    %25 = arith.subf %21, %24 : vector<8x8xf32>
    %26 = math.exp %25 : vector<8x8xf32>
    %cst_19 = arith.constant dense<0.000000e+00> : vector<8xf32>
    %27 = vector.multi_reduction <add>, %26, %cst_19 [1] : vector<8x8xf32> to vector<8xf32>
    %28 = vector.shape_cast %27 : vector<8xf32> to vector<8x1xf32>
    %29 = tpu.reciprocal %28 {approx = true} : vector<8x1xf32> -> vector<8x1xf32>
    %30 = vector.broadcast %29 : vector<8x1xf32> to vector<8x8xf32>
    %31 = arith.mulf %26, %30 : vector<8x8xf32>
    %32 = arith.truncf %31 : vector<8x8xf32> to vector<8x8xbf16>
    %cst_20 = arith.constant dense<0.000000e+00> : vector<8x8xf32>
    %33 = tpu.matmul %32, %19, %cst_20 {dimension_numbers = #tpu.dot_dimension_numbers<[1], [0], [0], [1], [0, 0, 1, 1], [], []>} : vector<8x8xbf16>, vector<8x8xbf16>, vector<8x8xf32> -> vector<8x8xf32>
    %34 = arith.truncf %33 : vector<8x8xf32> to vector<8x8xbf16>
    %c0_21 = arith.constant 0 : index
    %c0_22 = arith.constant 0 : index
    %c0_23 = arith.constant 0 : index
    %35 = vector.load %arg5[%c0_21, %c0_22, %c0_23] : memref<4x8x32xbf16, #tpu.memory_space<vmem>>, vector<1x8x32xbf16>
    %36 = vector.shape_cast %35 : vector<1x8x32xbf16> to vector<8x32xbf16>
    %cst_24 = arith.constant dense<0.000000e+00> : vector<8x32xf32>
    %37 = tpu.matmul %34, %36, %cst_24 {dimension_numbers = #tpu.dot_dimension_numbers<[1], [0], [0], [1], [0, 0, 1, 1], [], []>} : vector<8x8xbf16>, vector<8x32xbf16>, vector<8x32xf32> -> vector<8x32xf32>
    %38 = arith.addf %16, %37 : vector<8x32xf32>
    %39 = vector.extract_strided_slice %11 {offsets = [0, 8], sizes = [8, 8], strides = [1, 1]} : vector<16x96xbf16> to vector<8x8xbf16>
    %40 = vector.extract_strided_slice %11 {offsets = [0, 40], sizes = [8, 8], strides = [1, 1]} : vector<16x96xbf16> to vector<8x8xbf16>
    %41 = vector.extract_strided_slice %11 {offsets = [0, 72], sizes = [8, 8], strides = [1, 1]} : vector<16x96xbf16> to vector<8x8xbf16>
    %cst_25 = arith.constant dense<0.000000e+00> : vector<8x8xf32>
    %42 = tpu.matmul %39, %40, %cst_25 {dimension_numbers = #tpu.dot_dimension_numbers<[1], [1], [0], [0], [0, 0, 1, 0], [], []>} : vector<8x8xbf16>, vector<8x8xbf16>, vector<8x8xf32> -> vector<8x8xf32>
    %43 = arith.addf %42, %15 : vector<8x8xf32>
    %cst_26 = arith.constant dense<0xFF800000> : vector<8xf32>
    %44 = vector.multi_reduction <maximumf>, %43, %cst_26 [1] : vector<8x8xf32> to vector<8xf32>
    %45 = vector.shape_cast %44 : vector<8xf32> to vector<8x1xf32>
    %46 = vector.broadcast %45 : vector<8x1xf32> to vector<8x8xf32>
    %47 = arith.subf %43, %46 : vector<8x8xf32>
    %48 = math.exp %47 : vector<8x8xf32>
    %cst_27 = arith.constant dense<0.000000e+00> : vector<8xf32>
    %49 = vector.multi_reduction <add>, %48, %cst_27 [1] : vector<8x8xf32> to vector<8xf32>
    %50 = vector.shape_cast %49 : vector<8xf32> to vector<8x1xf32>
    %51 = tpu.reciprocal %50 {approx = true} : vector<8x1xf32> -> vector<8x1xf32>
    %52 = vector.broadcast %51 : vector<8x1xf32> to vector<8x8xf32>
    %53 = arith.mulf %48, %52 : vector<8x8xf32>
    %54 = arith.truncf %53 : vector<8x8xf32> to vector<8x8xbf16>
    %cst_28 = arith.constant dense<0.000000e+00> : vector<8x8xf32>
    %55 = tpu.matmul %54, %41, %cst_28 {dimension_numbers = #tpu.dot_dimension_numbers<[1], [0], [0], [1], [0, 0, 1, 1], [], []>} : vector<8x8xbf16>, vector<8x8xbf16>, vector<8x8xf32> -> vector<8x8xf32>
    %56 = arith.truncf %55 : vector<8x8xf32> to vector<8x8xbf16>
    %c1 = arith.constant 1 : index
    %c0_29 = arith.constant 0 : index
    %c0_30 = arith.constant 0 : index
    %57 = vector.load %arg5[%c1, %c0_29, %c0_30] : memref<4x8x32xbf16, #tpu.memory_space<vmem>>, vector<1x8x32xbf16>
    %58 = vector.shape_cast %57 : vector<1x8x32xbf16> to vector<8x32xbf16>
    %cst_31 = arith.constant dense<0.000000e+00> : vector<8x32xf32>
    %59 = tpu.matmul %56, %58, %cst_31 {dimension_numbers = #tpu.dot_dimension_numbers<[1], [0], [0], [1], [0, 0, 1, 1], [], []>} : vector<8x8xbf16>, vector<8x32xbf16>, vector<8x32xf32> -> vector<8x32xf32>
    %60 = arith.addf %38, %59 : vector<8x32xf32>
    %61 = vector.extract_strided_slice %11 {offsets = [0, 16], sizes = [8, 8], strides = [1, 1]} : vector<16x96xbf16> to vector<8x8xbf16>
    %62 = vector.extract_strided_slice %11 {offsets = [0, 48], sizes = [8, 8], strides = [1, 1]} : vector<16x96xbf16> to vector<8x8xbf16>
    %63 = vector.extract_strided_slice %11 {offsets = [0, 80], sizes = [8, 8], strides = [1, 1]} : vector<16x96xbf16> to vector<8x8xbf16>
    %cst_32 = arith.constant dense<0.000000e+00> : vector<8x8xf32>
    %64 = tpu.matmul %61, %62, %cst_32 {dimension_numbers = #tpu.dot_dimension_numbers<[1], [1], [0], [0], [0, 0, 1, 0], [], []>} : vector<8x8xbf16>, vector<8x8xbf16>, vector<8x8xf32> -> vector<8x8xf32>
    %65 = arith.addf %64, %15 : vector<8x8xf32>
    %cst_33 = arith.constant dense<0xFF800000> : vector<8xf32>
    %66 = vector.multi_reduction <maximumf>, %65, %cst_33 [1] : vector<8x8xf32> to vector<8xf32>
    %67 = vector.shape_cast %66 : vector<8xf32> to vector<8x1xf32>
    %68 = vector.broadcast %67 : vector<8x1xf32> to vector<8x8xf32>
    %69 = arith.subf %65, %68 : vector<8x8xf32>
    %70 = math.exp %69 : vector<8x8xf32>
    %cst_34 = arith.constant dense<0.000000e+00> : vector<8xf32>
    %71 = vector.multi_reduction <add>, %70, %cst_34 [1] : vector<8x8xf32> to vector<8xf32>
    %72 = vector.shape_cast %71 : vector<8xf32> to vector<8x1xf32>
    %73 = tpu.reciprocal %72 {approx = true} : vector<8x1xf32> -> vector<8x1xf32>
    %74 = vector.broadcast %73 : vector<8x1xf32> to vector<8x8xf32>
    %75 = arith.mulf %70, %74 : vector<8x8xf32>
    %76 = arith.truncf %75 : vector<8x8xf32> to vector<8x8xbf16>
    %cst_35 = arith.constant dense<0.000000e+00> : vector<8x8xf32>
    %77 = tpu.matmul %76, %63, %cst_35 {dimension_numbers = #tpu.dot_dimension_numbers<[1], [0], [0], [1], [0, 0, 1, 1], [], []>} : vector<8x8xbf16>, vector<8x8xbf16>, vector<8x8xf32> -> vector<8x8xf32>
    %78 = arith.truncf %77 : vector<8x8xf32> to vector<8x8xbf16>
    %c2 = arith.constant 2 : index
    %c0_36 = arith.constant 0 : index
    %c0_37 = arith.constant 0 : index
    %79 = vector.load %arg5[%c2, %c0_36, %c0_37] : memref<4x8x32xbf16, #tpu.memory_space<vmem>>, vector<1x8x32xbf16>
    %80 = vector.shape_cast %79 : vector<1x8x32xbf16> to vector<8x32xbf16>
    %cst_38 = arith.constant dense<0.000000e+00> : vector<8x32xf32>
    %81 = tpu.matmul %78, %80, %cst_38 {dimension_numbers = #tpu.dot_dimension_numbers<[1], [0], [0], [1], [0, 0, 1, 1], [], []>} : vector<8x8xbf16>, vector<8x32xbf16>, vector<8x32xf32> -> vector<8x32xf32>
    %82 = arith.addf %60, %81 : vector<8x32xf32>
    %83 = vector.extract_strided_slice %11 {offsets = [0, 24], sizes = [8, 8], strides = [1, 1]} : vector<16x96xbf16> to vector<8x8xbf16>
    %84 = vector.extract_strided_slice %11 {offsets = [0, 56], sizes = [8, 8], strides = [1, 1]} : vector<16x96xbf16> to vector<8x8xbf16>
    %85 = vector.extract_strided_slice %11 {offsets = [0, 88], sizes = [8, 8], strides = [1, 1]} : vector<16x96xbf16> to vector<8x8xbf16>
    %cst_39 = arith.constant dense<0.000000e+00> : vector<8x8xf32>
    %86 = tpu.matmul %83, %84, %cst_39 {dimension_numbers = #tpu.dot_dimension_numbers<[1], [1], [0], [0], [0, 0, 1, 0], [], []>} : vector<8x8xbf16>, vector<8x8xbf16>, vector<8x8xf32> -> vector<8x8xf32>
    %87 = arith.addf %86, %15 : vector<8x8xf32>
    %cst_40 = arith.constant dense<0xFF800000> : vector<8xf32>
    %88 = vector.multi_reduction <maximumf>, %87, %cst_40 [1] : vector<8x8xf32> to vector<8xf32>
    %89 = vector.shape_cast %88 : vector<8xf32> to vector<8x1xf32>
    %90 = vector.broadcast %89 : vector<8x1xf32> to vector<8x8xf32>
    %91 = arith.subf %87, %90 : vector<8x8xf32>
    %92 = math.exp %91 : vector<8x8xf32>
    %cst_41 = arith.constant dense<0.000000e+00> : vector<8xf32>
    %93 = vector.multi_reduction <add>, %92, %cst_41 [1] : vector<8x8xf32> to vector<8xf32>
    %94 = vector.shape_cast %93 : vector<8xf32> to vector<8x1xf32>
    %95 = tpu.reciprocal %94 {approx = true} : vector<8x1xf32> -> vector<8x1xf32>
    %96 = vector.broadcast %95 : vector<8x1xf32> to vector<8x8xf32>
    %97 = arith.mulf %92, %96 : vector<8x8xf32>
    %98 = arith.truncf %97 : vector<8x8xf32> to vector<8x8xbf16>
    %cst_42 = arith.constant dense<0.000000e+00> : vector<8x8xf32>
    %99 = tpu.matmul %98, %85, %cst_42 {dimension_numbers = #tpu.dot_dimension_numbers<[1], [0], [0], [1], [0, 0, 1, 1], [], []>} : vector<8x8xbf16>, vector<8x8xbf16>, vector<8x8xf32> -> vector<8x8xf32>
    %100 = arith.truncf %99 : vector<8x8xf32> to vector<8x8xbf16>
    %c3 = arith.constant 3 : index
    %c0_43 = arith.constant 0 : index
    %c0_44 = arith.constant 0 : index
    %101 = vector.load %arg5[%c3, %c0_43, %c0_44] : memref<4x8x32xbf16, #tpu.memory_space<vmem>>, vector<1x8x32xbf16>
    %102 = vector.shape_cast %101 : vector<1x8x32xbf16> to vector<8x32xbf16>
    %cst_45 = arith.constant dense<0.000000e+00> : vector<8x32xf32>
    %103 = tpu.matmul %100, %102, %cst_45 {dimension_numbers = #tpu.dot_dimension_numbers<[1], [0], [0], [1], [0, 0, 1, 1], [], []>} : vector<8x8xbf16>, vector<8x32xbf16>, vector<8x32xf32> -> vector<8x32xf32>
    %104 = arith.addf %82, %103 : vector<8x32xf32>
    %c1_46 = arith.constant 1 : index
    %c0_47 = arith.constant 0 : index
    %c0_48 = arith.constant 0 : index
    %c0_49 = arith.constant 0 : index
    %105 = vector.load %arg2[%c1_46, %c0_47, %c0_48, %c0_49] : memref<2x1x1x8xf32, #tpu.memory_space<vmem>>, vector<1x1x1x8xf32>
    %106 = vector.shape_cast %105 : vector<1x1x1x8xf32> to vector<1x8xf32>
    %107 = vector.shape_cast %106 : vector<1x8xf32> to vector<1x8xf32>
    %108 = vector.broadcast %107 : vector<1x8xf32> to vector<8x8xf32>
    %cst_50 = arith.constant 0.000000e+00 : f32
    %109 = vector.broadcast %cst_50 : f32 to vector<8x32xf32>
    %110 = vector.extract_strided_slice %11 {offsets = [8, 0], sizes = [8, 8], strides = [1, 1]} : vector<16x96xbf16> to vector<8x8xbf16>
    %111 = vector.extract_strided_slice %11 {offsets = [8, 32], sizes = [8, 8], strides = [1, 1]} : vector<16x96xbf16> to vector<8x8xbf16>
    %112 = vector.extract_strided_slice %11 {offsets = [8, 64], sizes = [8, 8], strides = [1, 1]} : vector<16x96xbf16> to vector<8x8xbf16>
    %cst_51 = arith.constant dense<0.000000e+00> : vector<8x8xf32>
    %113 = tpu.matmul %110, %111, %cst_51 {dimension_numbers = #tpu.dot_dimension_numbers<[1], [1], [0], [0], [0, 0, 1, 0], [], []>} : vector<8x8xbf16>, vector<8x8xbf16>, vector<8x8xf32> -> vector<8x8xf32>
    %114 = arith.addf %113, %108 : vector<8x8xf32>
    %cst_52 = arith.constant dense<0xFF800000> : vector<8xf32>
    %115 = vector.multi_reduction <maximumf>, %114, %cst_52 [1] : vector<8x8xf32> to vector<8xf32>
    %116 = vector.shape_cast %115 : vector<8xf32> to vector<8x1xf32>
    %117 = vector.broadcast %116 : vector<8x1xf32> to vector<8x8xf32>
    %118 = arith.subf %114, %117 : vector<8x8xf32>
    %119 = math.exp %118 : vector<8x8xf32>
    %cst_53 = arith.constant dense<0.000000e+00> : vector<8xf32>
    %120 = vector.multi_reduction <add>, %119, %cst_53 [1] : vector<8x8xf32> to vector<8xf32>
    %121 = vector.shape_cast %120 : vector<8xf32> to vector<8x1xf32>
    %122 = tpu.reciprocal %121 {approx = true} : vector<8x1xf32> -> vector<8x1xf32>
    %123 = vector.broadcast %122 : vector<8x1xf32> to vector<8x8xf32>
    %124 = arith.mulf %119, %123 : vector<8x8xf32>
    %125 = arith.truncf %124 : vector<8x8xf32> to vector<8x8xbf16>
    %cst_54 = arith.constant dense<0.000000e+00> : vector<8x8xf32>
    %126 = tpu.matmul %125, %112, %cst_54 {dimension_numbers = #tpu.dot_dimension_numbers<[1], [0], [0], [1], [0, 0, 1, 1], [], []>} : vector<8x8xbf16>, vector<8x8xbf16>, vector<8x8xf32> -> vector<8x8xf32>
    %127 = arith.truncf %126 : vector<8x8xf32> to vector<8x8xbf16>
    %c0_55 = arith.constant 0 : index
    %c0_56 = arith.constant 0 : index
    %c0_57 = arith.constant 0 : index
    %128 = vector.load %arg5[%c0_55, %c0_56, %c0_57] : memref<4x8x32xbf16, #tpu.memory_space<vmem>>, vector<1x8x32xbf16>
    %129 = vector.shape_cast %128 : vector<1x8x32xbf16> to vector<8x32xbf16>
    %cst_58 = arith.constant dense<0.000000e+00> : vector<8x32xf32>
    %130 = tpu.matmul %127, %129, %cst_58 {dimension_numbers = #tpu.dot_dimension_numbers<[1], [0], [0], [1], [0, 0, 1, 1], [], []>} : vector<8x8xbf16>, vector<8x32xbf16>, vector<8x32xf32> -> vector<8x32xf32>
    %131 = arith.addf %109, %130 : vector<8x32xf32>
    %132 = vector.extract_strided_slice %11 {offsets = [8, 8], sizes = [8, 8], strides = [1, 1]} : vector<16x96xbf16> to vector<8x8xbf16>
    %133 = vector.extract_strided_slice %11 {offsets = [8, 40], sizes = [8, 8], strides = [1, 1]} : vector<16x96xbf16> to vector<8x8xbf16>
    %134 = vector.extract_strided_slice %11 {offsets = [8, 72], sizes = [8, 8], strides = [1, 1]} : vector<16x96xbf16> to vector<8x8xbf16>
    %cst_59 = arith.constant dense<0.000000e+00> : vector<8x8xf32>
    %135 = tpu.matmul %132, %133, %cst_59 {dimension_numbers = #tpu.dot_dimension_numbers<[1], [1], [0], [0], [0, 0, 1, 0], [], []>} : vector<8x8xbf16>, vector<8x8xbf16>, vector<8x8xf32> -> vector<8x8xf32>
    %136 = arith.addf %135, %108 : vector<8x8xf32>
    %cst_60 = arith.constant dense<0xFF800000> : vector<8xf32>
    %137 = vector.multi_reduction <maximumf>, %136, %cst_60 [1] : vector<8x8xf32> to vector<8xf32>
    %138 = vector.shape_cast %137 : vector<8xf32> to vector<8x1xf32>
    %139 = vector.broadcast %138 : vector<8x1xf32> to vector<8x8xf32>
    %140 = arith.subf %136, %139 : vector<8x8xf32>
    %141 = math.exp %140 : vector<8x8xf32>
    %cst_61 = arith.constant dense<0.000000e+00> : vector<8xf32>
    %142 = vector.multi_reduction <add>, %141, %cst_61 [1] : vector<8x8xf32> to vector<8xf32>
    %143 = vector.shape_cast %142 : vector<8xf32> to vector<8x1xf32>
    %144 = tpu.reciprocal %143 {approx = true} : vector<8x1xf32> -> vector<8x1xf32>
    %145 = vector.broadcast %144 : vector<8x1xf32> to vector<8x8xf32>
    %146 = arith.mulf %141, %145 : vector<8x8xf32>
    %147 = arith.truncf %146 : vector<8x8xf32> to vector<8x8xbf16>
    %cst_62 = arith.constant dense<0.000000e+00> : vector<8x8xf32>
    %148 = tpu.matmul %147, %134, %cst_62 {dimension_numbers = #tpu.dot_dimension_numbers<[1], [0], [0], [1], [0, 0, 1, 1], [], []>} : vector<8x8xbf16>, vector<8x8xbf16>, vector<8x8xf32> -> vector<8x8xf32>
    %149 = arith.truncf %148 : vector<8x8xf32> to vector<8x8xbf16>
    %c1_63 = arith.constant 1 : index
    %c0_64 = arith.constant 0 : index
    %c0_65 = arith.constant 0 : index
    %150 = vector.load %arg5[%c1_63, %c0_64, %c0_65] : memref<4x8x32xbf16, #tpu.memory_space<vmem>>, vector<1x8x32xbf16>
    %151 = vector.shape_cast %150 : vector<1x8x32xbf16> to vector<8x32xbf16>
    %cst_66 = arith.constant dense<0.000000e+00> : vector<8x32xf32>
    %152 = tpu.matmul %149, %151, %cst_66 {dimension_numbers = #tpu.dot_dimension_numbers<[1], [0], [0], [1], [0, 0, 1, 1], [], []>} : vector<8x8xbf16>, vector<8x32xbf16>, vector<8x32xf32> -> vector<8x32xf32>
    %153 = arith.addf %131, %152 : vector<8x32xf32>
    %154 = vector.extract_strided_slice %11 {offsets = [8, 16], sizes = [8, 8], strides = [1, 1]} : vector<16x96xbf16> to vector<8x8xbf16>
    %155 = vector.extract_strided_slice %11 {offsets = [8, 48], sizes = [8, 8], strides = [1, 1]} : vector<16x96xbf16> to vector<8x8xbf16>
    %156 = vector.extract_strided_slice %11 {offsets = [8, 80], sizes = [8, 8], strides = [1, 1]} : vector<16x96xbf16> to vector<8x8xbf16>
    %cst_67 = arith.constant dense<0.000000e+00> : vector<8x8xf32>
    %157 = tpu.matmul %154, %155, %cst_67 {dimension_numbers = #tpu.dot_dimension_numbers<[1], [1], [0], [0], [0, 0, 1, 0], [], []>} : vector<8x8xbf16>, vector<8x8xbf16>, vector<8x8xf32> -> vector<8x8xf32>
    %158 = arith.addf %157, %108 : vector<8x8xf32>
    %cst_68 = arith.constant dense<0xFF800000> : vector<8xf32>
    %159 = vector.multi_reduction <maximumf>, %158, %cst_68 [1] : vector<8x8xf32> to vector<8xf32>
    %160 = vector.shape_cast %159 : vector<8xf32> to vector<8x1xf32>
    %161 = vector.broadcast %160 : vector<8x1xf32> to vector<8x8xf32>
    %162 = arith.subf %158, %161 : vector<8x8xf32>
    %163 = math.exp %162 : vector<8x8xf32>
    %cst_69 = arith.constant dense<0.000000e+00> : vector<8xf32>
    %164 = vector.multi_reduction <add>, %163, %cst_69 [1] : vector<8x8xf32> to vector<8xf32>
    %165 = vector.shape_cast %164 : vector<8xf32> to vector<8x1xf32>
    %166 = tpu.reciprocal %165 {approx = true} : vector<8x1xf32> -> vector<8x1xf32>
    %167 = vector.broadcast %166 : vector<8x1xf32> to vector<8x8xf32>
    %168 = arith.mulf %163, %167 : vector<8x8xf32>
    %169 = arith.truncf %168 : vector<8x8xf32> to vector<8x8xbf16>
    %cst_70 = arith.constant dense<0.000000e+00> : vector<8x8xf32>
    %170 = tpu.matmul %169, %156, %cst_70 {dimension_numbers = #tpu.dot_dimension_numbers<[1], [0], [0], [1], [0, 0, 1, 1], [], []>} : vector<8x8xbf16>, vector<8x8xbf16>, vector<8x8xf32> -> vector<8x8xf32>
    %171 = arith.truncf %170 : vector<8x8xf32> to vector<8x8xbf16>
    %c2_71 = arith.constant 2 : index
    %c0_72 = arith.constant 0 : index
    %c0_73 = arith.constant 0 : index
    %172 = vector.load %arg5[%c2_71, %c0_72, %c0_73] : memref<4x8x32xbf16, #tpu.memory_space<vmem>>, vector<1x8x32xbf16>
    %173 = vector.shape_cast %172 : vector<1x8x32xbf16> to vector<8x32xbf16>
    %cst_74 = arith.constant dense<0.000000e+00> : vector<8x32xf32>
    %174 = tpu.matmul %171, %173, %cst_74 {dimension_numbers = #tpu.dot_dimension_numbers<[1], [0], [0], [1], [0, 0, 1, 1], [], []>} : vector<8x8xbf16>, vector<8x32xbf16>, vector<8x32xf32> -> vector<8x32xf32>
    %175 = arith.addf %153, %174 : vector<8x32xf32>
    %176 = vector.extract_strided_slice %11 {offsets = [8, 24], sizes = [8, 8], strides = [1, 1]} : vector<16x96xbf16> to vector<8x8xbf16>
    %177 = vector.extract_strided_slice %11 {offsets = [8, 56], sizes = [8, 8], strides = [1, 1]} : vector<16x96xbf16> to vector<8x8xbf16>
    %178 = vector.extract_strided_slice %11 {offsets = [8, 88], sizes = [8, 8], strides = [1, 1]} : vector<16x96xbf16> to vector<8x8xbf16>
    %cst_75 = arith.constant dense<0.000000e+00> : vector<8x8xf32>
    %179 = tpu.matmul %176, %177, %cst_75 {dimension_numbers = #tpu.dot_dimension_numbers<[1], [1], [0], [0], [0, 0, 1, 0], [], []>} : vector<8x8xbf16>, vector<8x8xbf16>, vector<8x8xf32> -> vector<8x8xf32>
    %180 = arith.addf %179, %108 : vector<8x8xf32>
    %cst_76 = arith.constant dense<0xFF800000> : vector<8xf32>
    %181 = vector.multi_reduction <maximumf>, %180, %cst_76 [1] : vector<8x8xf32> to vector<8xf32>
    %182 = vector.shape_cast %181 : vector<8xf32> to vector<8x1xf32>
    %183 = vector.broadcast %182 : vector<8x1xf32> to vector<8x8xf32>
    %184 = arith.subf %180, %183 : vector<8x8xf32>
    %185 = math.exp %184 : vector<8x8xf32>
    %cst_77 = arith.constant dense<0.000000e+00> : vector<8xf32>
    %186 = vector.multi_reduction <add>, %185, %cst_77 [1] : vector<8x8xf32> to vector<8xf32>
    %187 = vector.shape_cast %186 : vector<8xf32> to vector<8x1xf32>
    %188 = tpu.reciprocal %187 {approx = true} : vector<8x1xf32> -> vector<8x1xf32>
    %189 = vector.broadcast %188 : vector<8x1xf32> to vector<8x8xf32>
    %190 = arith.mulf %185, %189 : vector<8x8xf32>
    %191 = arith.truncf %190 : vector<8x8xf32> to vector<8x8xbf16>
    %cst_78 = arith.constant dense<0.000000e+00> : vector<8x8xf32>
    %192 = tpu.matmul %191, %178, %cst_78 {dimension_numbers = #tpu.dot_dimension_numbers<[1], [0], [0], [1], [0, 0, 1, 1], [], []>} : vector<8x8xbf16>, vector<8x8xbf16>, vector<8x8xf32> -> vector<8x8xf32>
    %193 = arith.truncf %192 : vector<8x8xf32> to vector<8x8xbf16>
    %c3_79 = arith.constant 3 : index
    %c0_80 = arith.constant 0 : index
    %c0_81 = arith.constant 0 : index
    %194 = vector.load %arg5[%c3_79, %c0_80, %c0_81] : memref<4x8x32xbf16, #tpu.memory_space<vmem>>, vector<1x8x32xbf16>
    %195 = vector.shape_cast %194 : vector<1x8x32xbf16> to vector<8x32xbf16>
    %cst_82 = arith.constant dense<0.000000e+00> : vector<8x32xf32>
    %196 = tpu.matmul %193, %195, %cst_82 {dimension_numbers = #tpu.dot_dimension_numbers<[1], [0], [0], [1], [0, 0, 1, 1], [], []>} : vector<8x8xbf16>, vector<8x32xbf16>, vector<8x32xf32> -> vector<8x32xf32>
    %197 = arith.addf %175, %196 : vector<8x32xf32>
    %198 = tpu.concatenate %104, %197 in 0 : vector<8x32xf32>, vector<8x32xf32> -> vector<16x32xf32>
    %199 = vector.broadcast %2 : vector<1x32xf32> to vector<16x32xf32>
    %200 = arith.addf %198, %199 : vector<16x32xf32>
    %201 = arith.addf %200, %6 : vector<16x32xf32>
    %cst_83 = arith.constant dense<0.000000e+00> : vector<16xf32>
    %202 = vector.multi_reduction <add>, %201, %cst_83 [1] : vector<16x32xf32> to vector<16xf32>
    %203 = vector.shape_cast %202 : vector<16xf32> to vector<16x1xf32>
    %cst_84 = arith.constant 3.200000e+01 : f32
    %204 = vector.broadcast %cst_84 : f32 to vector<16x1xf32>
    %205 = arith.divf %203, %204 : vector<16x1xf32>
    %206 = vector.broadcast %205 : vector<16x1xf32> to vector<16x32xf32>
    %207 = arith.subf %201, %206 : vector<16x32xf32>
    %208 = vector.broadcast %205 : vector<16x1xf32> to vector<16x32xf32>
    %209 = arith.subf %201, %208 : vector<16x32xf32>
    %210 = arith.mulf %207, %209 : vector<16x32xf32>
    %cst_85 = arith.constant dense<0.000000e+00> : vector<16xf32>
    %211 = vector.multi_reduction <add>, %210, %cst_85 [1] : vector<16x32xf32> to vector<16xf32>
    %212 = vector.shape_cast %211 : vector<16xf32> to vector<16x1xf32>
    %cst_86 = arith.constant 3.200000e+01 : f32
    %213 = vector.broadcast %cst_86 : f32 to vector<16x1xf32>
    %214 = arith.divf %212, %213 : vector<16x1xf32>
    %215 = vector.broadcast %205 : vector<16x1xf32> to vector<16x32xf32>
    %216 = arith.subf %201, %215 : vector<16x32xf32>
    %cst_87 = arith.constant 9.99999996E-13 : f32
    %217 = vector.broadcast %cst_87 : f32 to vector<16x1xf32>
    %218 = arith.addf %214, %217 : vector<16x1xf32>
    %219 = math.rsqrt %218 : vector<16x1xf32>
    %220 = vector.broadcast %219 : vector<16x1xf32> to vector<16x32xf32>
    %221 = arith.mulf %216, %220 : vector<16x32xf32>
    %222 = vector.broadcast %3 : vector<1x32xf32> to vector<16x32xf32>
    %223 = arith.mulf %222, %221 : vector<16x32xf32>
    %224 = vector.broadcast %4 : vector<1x32xf32> to vector<16x32xf32>
    %225 = arith.addf %223, %224 : vector<16x32xf32>
    %226 = vector.shape_cast %225 : vector<16x32xf32> to vector<2x8x32xf32>
    %c0_88 = arith.constant 0 : index
    %c0_89 = arith.constant 0 : index
    %c0_90 = arith.constant 0 : index
    %227 = vector.load %arg9[%c0_88, %c0_89, %c0_90] : memref<2x8x32xf32, #tpu.memory_space<vmem>>, vector<2x8x32xf32>
    tpu.vector_store %arg9[%c0_88, %c0_89, %c0_90], %226 {strides = array<i32>} : memref<2x8x32xf32, #tpu.memory_space<vmem>>, vector<2x8x32xf32>,
    return
  }
  func.func @transform_0(%arg0: i32) -> (i32, i32, i32) {
    %c0_i32 = arith.constant 0 : i32
    %c0_i32_0 = arith.constant 0 : i32
    %c0_i32_1 = arith.constant 0 : i32
    return %arg0, %c0_i32, %c0_i32_0 : i32, i32, i32
  }
  func.func @transform_1(%arg0: i32) -> (i32, i32, i32, i32) {
    %c0_i32 = arith.constant 0 : i32
    %c0_i32_0 = arith.constant 0 : i32
    %c0_i32_1 = arith.constant 0 : i32
    %c0_i32_2 = arith.constant 0 : i32
    return %arg0, %c0_i32, %c0_i32_0, %c0_i32_1 : i32, i32, i32, i32
  }
  func.func @transform_2(%arg0: i32) -> (i32, i32) {
    %c0_i32 = arith.constant 0 : i32
    %c0_i32_0 = arith.constant 0 : i32
    %c0_i32_1 = arith.constant 0 : i32
    return %c0_i32, %c0_i32_0 : i32, i32
  }
  func.func @transform_3(%arg0: i32) -> (i32, i32) {
    %c0_i32 = arith.constant 0 : i32
    %c0_i32_0 = arith.constant 0 : i32
    %c0_i32_1 = arith.constant 0 : i32
    return %c0_i32, %c0_i32_0 : i32, i32
  }
  func.func @transform_4(%arg0: i32) -> (i32, i32, i32) {
    %c0_i32 = arith.constant 0 : i32
    %c0_i32_0 = arith.constant 0 : i32
    %c0_i32_1 = arith.constant 0 : i32
    %c0_i32_2 = arith.constant 0 : i32
    return %c0_i32, %c0_i32_0, %c0_i32_1 : i32, i32, i32
  }
  func.func @transform_5(%arg0: i32) -> (i32, i32) {
    %c0_i32 = arith.constant 0 : i32
    %c0_i32_0 = arith.constant 0 : i32
    %c0_i32_1 = arith.constant 0 : i32
    return %c0_i32, %c0_i32_0 : i32, i32
  }
  func.func @transform_6(%arg0: i32) -> (i32, i32) {
    %c0_i32 = arith.constant 0 : i32
    %c0_i32_0 = arith.constant 0 : i32
    %c0_i32_1 = arith.constant 0 : i32
    return %c0_i32, %c0_i32_0 : i32, i32
  }
  func.func @transform_7(%arg0: i32) -> (i32, i32) {
    %c0_i32 = arith.constant 0 : i32
    %c0_i32_0 = arith.constant 0 : i32
    %c0_i32_1 = arith.constant 0 : i32
    return %c0_i32, %c0_i32_0 : i32, i32
  }
  func.func @transform_8(%arg0: i32) -> (i32, i32, i32) {
    %c0_i32 = arith.constant 0 : i32
    %c0_i32_0 = arith.constant 0 : i32
    %c0_i32_1 = arith.constant 0 : i32
    return %arg0, %c0_i32, %c0_i32_0 : i32, i32, i32
  }
}

</mosaic_0001>

<bundles_post_ra>
// kernel: tpu_custom_call.1
= control target key start
LH: loop header
LB: loop body
LE: loop exit
PB: predicated region body
PF: predicated region fallthrough
CT: control target
= control target key end

     0   :  { %13 = vsyncpa [#allocation3], 0  ;;  %s2264_s0 = inlined_call_operand.hbm [shape: f32[2,8,32], index: 0, kind: input, shape index: {}]   ;;  %s2265_s1 = inlined_call_operand.vmem [shape: f32[2,1,1,8], index: 1, kind: input, shape index: {}]   ;;  %s2266_s2 = inlined_call_operand.hbm [shape: bf16[32,96], index: 2, kind: input, shape index: {}]   ;;  %s2267_s3 = inlined_call_operand.vmem [shape: f32[1,96], index: 3, kind: input, shape index: {}]   ;;  %s2268_s4 = inlined_call_operand.hbm [shape: bf16[4,8,32], index: 4, kind: input, shape index: {}]   ;;  %s2269_s5 = inlined_call_operand.vmem [shape: f32[1,32], index: 5, kind: input, shape index: {}]   ;;  %s2270_s6 = inlined_call_operand.vmem [shape: f32[1,32], index: 6, kind: input, shape index: {}]   ;;  %s2271_s7 = inlined_call_operand.vmem [shape: f32[1,32], index: 7, kind: input, shape index: {}]   ;;  %s2272_s8 = inlined_call_operand.hbm [shape: f32[2,8,32], index: 8, kind: output, shape index: {}]  }
   0x1   :  { %14 = vsyncpa [#allocation6], 0 }
   0x2   :  { %15 = vsyncpa [#allocation4], 0  ;;  %s1879_s27 = smov [#allocation5]   ;;  %s1785_s9 = scalar_lea.hbm %s2266_s2, 256 }
   0x3   :  { %s35_s28 = sshll.u32 %s1879_s27, 4  ;;  %p1786_p0 = scmp.ne.s32.totalorder %s2266_s2, %s1785_s9  ;;  %s36_s28 = int_to_ptr.vmem [resolvable:$true] %s35_s28 }
   0x4   :  { %p1789_p1 = scmp.lt.u32.totalorder %s1785_s9, %s2266_s2 }
   0x6   :  { %p1791_p2 = pnand %p1789_p1, %p1786_p0 }
   0x8   :  { %1794 = shalt.err (!%p1791_p2)
}
   0x9   :  { %s1795_s14 = scalar_lea.vmem %s36_s28, 256  ;;  %p1800_p4 = scmp.lt.s32.totalorder %s36_s28, %s36_s28 }
   0xa   :  { %p1796_p3 = scmp.ne.s32.totalorder %s36_s28, %s1795_s14  ;;  %p1801_p5 = scmp.lt.s32.totalorder %s1795_s14, %s1795_s14 }
   0xc   :  { %p1802_p6 = por %p1801_p5, %p1800_p4 }
   0xe   :  { %p1803_p7 = pnand %p1802_p6, %p1796_p3 }
  0x10   :  { %1806 = shalt.err (!%p1803_p7)
}
  0x11   :  { %s1880_s15 = smov 64   ;;  %s1881_s16 = smov 4  }
  0x12   :  { %41 = dma.hbm_to_vmem [thread:$0]  %s2266_s2, 256, %s36_s28, [#allocation6], %s1880_s15, %s1880_s15, %s1881_s16  }
  0x13   :  { %s1882_s19 = smov [#allocation2]   ;;  %s1807_s23 = scalar_lea.hbm %s2264_s0, 256 }
  0x14   :  { %s21_s20 = sshll.u32 %s1882_s19, 4  ;;  %p1808_p8 = scmp.ne.s32.totalorder %s2264_s0, %s1807_s23  ;;  %s22_s20 = int_to_ptr.vmem [resolvable:$true] %s21_s20 }
  0x15   :  { %p1811_p9 = scmp.lt.u32.totalorder %s1807_s23, %s2264_s0 }
  0x17   :  { %p1813_p10 = pnand %p1811_p9, %p1808_p8 }
  0x19   :  { %1816 = shalt.err (!%p1813_p10)
}
  0x1a   :  { %s1817_s29 = scalar_lea.vmem %s22_s20, 256  ;;  %p1822_p12 = scmp.lt.s32.totalorder %s22_s20, %s22_s20 }
  0x1b   :  { %p1818_p11 = scmp.ne.s32.totalorder %s22_s20, %s1817_s29  ;;  %p1823_p13 = scmp.lt.s32.totalorder %s1817_s29, %s1817_s29 }
  0x1d   :  { %p1824_p0 = por %p1823_p13, %p1822_p12 }
  0x1f   :  { %p1825_p1 = pnand %p1824_p0, %p1818_p11 }
  0x21   :  { %1828 = shalt.err (!%p1825_p1)
}
  0x22   :  { %s1883_s2 = smov 128   ;;  %s1884_s28 = smov 8  }
  0x23   :  { %27 = dma.hbm_to_vmem [thread:$0]  %s2264_s0, 256, %s22_s20, [#allocation3], %s1883_s2, %s1883_s2, %s1884_s28  }
  0x24   :  { %s1885_s10 = smov [#allocation7]   ;;  %s1829_s14 = scalar_lea.hbm %s2268_s4, 256 }
  0x25   :  { %s49_s11 = sshll.u32 %s1885_s10, 4  ;;  %p1830_p2 = scmp.ne.s32.totalorder %s2268_s4, %s1829_s14  ;;  %s50_s11 = int_to_ptr.vmem [resolvable:$true] %s49_s11 }
  0x26   :  { %p1833_p3 = scmp.lt.u32.totalorder %s1829_s14, %s2268_s4 }
  0x28   :  { %p1835_p4 = pnand %p1833_p3, %p1830_p2 }
  0x2a   :  { %1838 = shalt.err (!%p1835_p4)
}
  0x2b   :  { %s1839_s22 = scalar_lea.vmem %s50_s11, 256  ;;  %p1844_p6 = scmp.lt.s32.totalorder %s50_s11, %s50_s11 }
  0x2c   :  { %p1840_p5 = scmp.ne.s32.totalorder %s50_s11, %s1839_s22  ;;  %p1845_p7 = scmp.lt.s32.totalorder %s1839_s22, %s1839_s22 }
  0x2e   :  { %p1846_p8 = por %p1845_p7, %p1844_p6 }
  0x30   :  { %p1847_p9 = pnand %p1846_p8, %p1840_p5 }
  0x32   :  { %1850 = shalt.err (!%p1847_p9)
}
  0x33   :  { %55 = dma.hbm_to_vmem [thread:$0]  %s2268_s4, 256, %s50_s11, [#allocation6], %s1880_s15, %s1880_s15, %s1881_s16  }
  0x34   :  { %1873 = dma.done.wait [#allocation3], 256  }
  0x35   :  { %1874 = vsyncadd [#allocation3], 4294967040 }
  0x36   :  { %1875 = dma.done.wait [#allocation6], 512  }
  0x37   :  { %1876 = vsyncadd [#allocation6], 4294966784  ;;  %v1886_v0 = vmov 0.0   ;;  %vm1887_vm0 = vmmov 0   ;;  %v1747_v1 = vld [vmem:[#allocation5] sm:$0xff]   ;;  %v1748_v2 = vld [vmem:[#allocation5 + $0x8] sm:$0xff]  }
  0x38   :  { %1575 = vmatprep.subr.bf16.mxu0 %v1886_v0  ;;  %1579 = vmatprep.mubr.msk.bf16.mxu0 %vm1887_vm0, %v1886_v0  ;;  %v1995_v3 = vld [vmem:[#allocation2] sm:$0xff]  ;;  %v1997_v4 = vld [vmem:[#allocation2 + $0x8] sm:$0xff]  ;;  %vm101_vm1 = vcmask 261120   ;;  %s1888_s23 = smov 120   ;;  %s1889_s24 = smov 96   ;;  %vm157_vm2 = vcmask 64512  }
  0x39   :  { %1583 = vmatprep.subr.bf16.mxu1 %v1886_v0  ;;  %1585 = vmatprep.mubr.msk.bf16.mxu1 %vm1887_vm0, %v1886_v0  ;;  %v82_v5 = vpack.c.bf16 %v1997_v4, %v1995_v3  ;;  %v1490_v6 = vld [vmem:[%s2267_s3] ss:$0 sm:$0xff]  ;;  %s1890_s25 = smov 88   ;;  %s1891_s27 = smov 56   ;;  %vm221_vm3 = vcmask 1043456  }
  0x3a   :  { %1576 = vmatpush3.bf16.msra.mxu0 %v1747_v1  ;;  %v2031_v19 = vld [vmem:[%s2265_s1] ss:$0 sm:$0xff]  ;;  %s1892_s29 = smov 112   ;;  %s1893_s30 = smov 80   ;;  %v379_v56 = vld [vmem:[#allocation7 + $0x4] sm:$0xf] }
  0x3b   :  { %1577 = vmatprep.subr.bf16.mxu0 %v1886_v0  ;;  %v266_v54 = vld [vmem:[#allocation7] sm:$0xf]  ;;  %v2062_v57 = vsel %vm221_vm3, %v379_v56, 0  ;;  %s1894_s9 = smov 72   ;;  %s1895_s10 = smov 104  }
  0x3c   :  { %v2058_v55 = vsel %vm221_vm3, %v266_v54, 0  ;;  %s1896_s11 = smov 48   ;;  %s1897_s12 = smov 40  }
  0x3d   :  { %s1898_s21 = smov [#allocation8]  }
  0x3e   :  { %1578 = vmatpush3.bf16.msra.mxu0 %v1748_v2  ;;  %s1477_s22 = sshll.u32 %s1898_s21, 4  ;;  %s1478_s22 = int_to_ptr.vmem [resolvable:$true] %s1477_s22 }
  0x3f   :  { %1589 = vmatprep.subr.bf16.mxu0 %v1886_v0  ;;  %p1856_p11 = scmp.lt.s32.totalorder %s1478_s22, %s1478_s22 }
  0x41   :  { %1580 = vmatmul.mubr.msk.bf16.vlgmr.msra.gmra.mrb[0].mxu0 %vm101_vm1, %v82_v5 }
  0x42   :  { %1591 = vmatprep.mubr.msk.bf16.mxu0 %vm1887_vm0, %v1886_v0 }
 0x114   :  { %v139_v7 = vpop.f32.mrb[0].mxu0 }
 0x115   :  { %v1581_v8 = vpop.f32.mrb[1].mxu0  ;;  %v140_v10 = vadd.f32 %v1490_v6, %v139_v7 }
 0x116   :  { %v142_v9 = vpop.f32.mrb[2].mxu0 }
 0x117   :  { %v143_v11 = vadd.f32 %v1490_v6, %v142_v9  ;;  %v1582_v12 = vpop.f32.mrb[3].mxu0 }
 0x119   :  { %v2009_v13 = vpack.c.bf16 %v143_v11, %v140_v10 }
 0x11b   :  { %267 = vrot.lane.b32.xlu1 %v2009_v13, %s1888_s23  ;;  %155 = vrot.lane.b32.xlu0 %v2009_v13, %s1889_s24  ;;  %v2112_v54 = vrot.slane %v2009_v13, 4 }
 0x11f   :  { %269 = vrot.lane.b32.xlu0 %v2009_v13, %s1890_s25 }
 0x18d   :  { %v156_v14 = vpop.permute.xlu0 %155  ;;  %v268_v18 = vpop.permute.xlu1 %267 }
 0x18e   :  { %v162_v15 = vsel %vm157_vm2, %v156_v14, 0 }
 0x18f   :  { %1584 = vmatpush3.bf16.xpose.msra.mxu1 %v162_v15 }
 0x190   :  { %1595 = vmatprep.subr.bf16.mxu1 %v1886_v0 }
 0x191   :  { %v270_v16 = vpop.permute.xlu0 %269 }
 0x192   :  { %v275_v17 = vsel %vm157_vm2, %v270_v16, 0 }
 0x196   :  { %1586 = vmatmul.mubr.msk.bf16.vlgmr.msra.gmra.mrb[0].mxu1 %vm157_vm2, %v2009_v13 }
 0x197   :  { %1596 = vmatpush3.bf16.xpose.msra.mxu1 %v275_v17  ;;  %1597 = vmatprep.mubr.msk.bf16.mxu1 %vm1887_vm0, %v1886_v0 }
 0x198   :  { %1607 = vmatprep.subr.bf16.mxu1 %v1886_v0 }
 0x19e   :  { %1598 = vmatmul.mubr.msk.bf16.vlgmr.msra.gmra.mrb[4].mxu1 %vm157_vm2, %v268_v18 }
 0x19f   :  { %1609 = vmatprep.mubr.msk.bf16.mxu1 %vm1887_vm0, %v1886_v0  ;;  %1608 = vmatpush3.bf16.msra.mxu1 %v2062_v57 }
 0x1a0   :  { %1619 = vmatprep.subr.bf16.mxu1 %v1886_v0 }
 0x269   :  { %v198_v20 = vpop.f32.mrb[0].mxu1 }
 0x26a   :  { %v199_v21 = vadd.f32 %v2031_v19, %v198_v20  ;;  %v1587_v22 = vpop.f32.mrb[1].mxu1 }
 0x26b   :  { %v201_v23 = vpop.f32.mrb[2].mxu1 }
 0x26c   :  { %v1588_v24 = vpop.f32.mrb[3].mxu1  ;;  %v204_v25 = vsel %vm157_vm2, %v199_v21, -inf }
 0x26d   :  { %205 = vmax.xlane.f32.xlu1 %v204_v25 }
 0x271   :  { %v311_v26 = vpop.f32.mrb[4].mxu1 }
 0x272   :  { %v312_v27 = vadd.f32 %v2031_v19, %v311_v26  ;;  %v1599_v28 = vpop.f32.mrb[5].mxu1 }
 0x273   :  { %v314_v29 = vpop.f32.mrb[6].mxu1 }
 0x274   :  { %v1600_v30 = vpop.f32.mrb[7].mxu1  ;;  %v317_v31 = vsel %vm157_vm2, %v312_v27, -inf }
 0x275   :  { %318 = vmax.xlane.f32.xlu0 %v317_v31 }
 0x2fa   :  { %v206_v32 = vpop.xlane.xlu1 %205 }
 0x2fb   :  { %v207_v33 = vsub.f32 %v199_v21, %v206_v32 }
 0x2fd   :  { %v208_v34 = vmul.f32 1.442695, %v207_v33 }
 0x2ff   :  { %1749 = vpow2.f32 %v208_v34 }
 0x302   :  { %v319_v35 = vpop.xlane.xlu0 %318 }
 0x303   :  { %v320_v36 = vsub.f32 %v312_v27, %v319_v35 }
 0x305   :  { %v321_v37 = vmul.f32 1.442695, %v320_v36 }
 0x307   :  { %1751 = vpow2.f32 %v321_v37 }
 0x309   :  { %v1750_v38 = vpop.eup %1749 }
 0x30a   :  { %v210_v39 = vsel %vm157_vm2, %v1750_v38, 0.0 }
 0x30b   :  { %211 = vadd.xlane.f32.xlu0 %v210_v39 }
 0x311   :  { %v1752_v40 = vpop.eup %1751 }
 0x312   :  { %v323_v41 = vsel %vm157_vm2, %v1752_v40, 0.0 }
 0x313   :  { %324 = vadd.xlane.f32.xlu1 %v323_v41  ;;  %v584_v41 = vld [vmem:[#allocation7 + $0x8] sm:$0xf] }
 0x321   :  { %216 = vrot.lane.b32.xlu0 %v2009_v13, %s1880_s15 }
 0x324   :  { %329 = vrot.lane.b32.xlu1 %v2009_v13, %s1891_s27 }
 0x325   :  { %472 = vrot.lane.b32.xlu0 %v2009_v13, %s1892_s29 }
 0x328   :  { %474 = vrot.lane.b32.xlu1 %v2009_v13, %s1893_s30 }
 0x398   :  { %v212_v42 = vpop.xlane.xlu0 %211 }
 0x399   :  { %1753 = vrcp.f32 %v212_v42  ;;  %v2100_v42 = vsel %vm221_vm3, %v584_v41, 0 }
 0x39c   :  { %v217_v43 = vpop.permute.xlu0 %216 }
 0x39d   :  { %v223_v44 = vsel %vm221_vm3, %v217_v43, 0 }
 0x39e   :  { %1590 = vmatpush3.bf16.msra.mxu0 %v223_v44 }
 0x39f   :  { %1601 = vmatprep.subr.bf16.mxu0 %v1886_v0 }
 0x3a0   :  { %v325_v45 = vpop.xlane.xlu1 %324  ;;  %v473_v9 = vpop.permute.xlu0 %472 }
 0x3a1   :  { %1755 = vrcp.f32 %v325_v45 }
 0x3a3   :  { %v1754_v46 = vpop.eup %1753 }
 0x3a4   :  { %v214_v47 = vmul.f32 %v1754_v46, %v1750_v38  ;;  %v330_v48 = vpop.permute.xlu1 %329 }
 0x3a5   :  { %v335_v50 = vsel %vm221_vm3, %v330_v48, 0 }
 0x3a6   :  { %v215_v49 = vpack.c.bf16 %v214_v47, %v214_v47 }
 0x3a8   :  { %1592 = vmatmul.mubr.msk.bf16.vlgmr.msra.gmra.mrb[4].mxu0 %vm157_vm2, %v215_v49  ;;  %v475_v63 = vpop.permute.xlu1 %474 }
 0x3a9   :  { %1602 = vmatpush3.bf16.msra.mxu0 %v335_v50  ;;  %1603 = vmatprep.mubr.msk.bf16.mxu0 %vm1887_vm0, %v1886_v0  ;;  %v480_v7 = vsel %vm157_vm2, %v475_v63, 0 }
 0x3aa   :  { %1613 = vmatprep.subr.bf16.mxu0 %v1886_v0 }
 0x3ab   :  { %v1756_v51 = vpop.eup %1755 }
 0x3ac   :  { %v327_v52 = vmul.f32 %v1756_v51, %v1752_v40 }
 0x3ae   :  { %v328_v53 = vpack.c.bf16 %v327_v52, %v327_v52 }
 0x3b0   :  { %1604 = vmatmul.mubr.msk.bf16.vlgmr.msra.gmra.mrb[8].mxu0 %vm157_vm2, %v328_v53 }
 0x3b1   :  { %1615 = vmatprep.mubr.msk.bf16.mxu0 %vm1887_vm0, %v1886_v0  ;;  %1614 = vmatpush3.bf16.msra.mxu0 %v2058_v55 }
 0x3b2   :  { %1625 = vmatprep.subr.bf16.mxu0 %v1886_v0 }
 0x47b   :  { %v259_v58 = vpop.f32.mrb[4].mxu0 }
 0x47c   :  { %v265_v59 = vpack.c.bf16 %v259_v58, %v259_v58  ;;  %v1593_v60 = vpop.f32.mrb[5].mxu0 }
 0x47d   :  { %v262_v61 = vpop.f32.mrb[6].mxu0 }
 0x47e   :  { %v1594_v62 = vpop.f32.mrb[7].mxu0  ;;  %1616 = vmatmul.mubr.msk.bf16.vlgmr.msra.gmra.mrb[12].mxu0 %vm157_vm2, %v265_v59 }
 0x47f   :  { %1627 = vmatprep.mubr.msk.bf16.mxu0 %vm1887_vm0, %v1886_v0 }
 0x483   :  { %v371_v1 = vpop.f32.mrb[8].mxu0 }
 0x484   :  { %v377_v2 = vpack.c.bf16 %v371_v1, %v371_v1  ;;  %v1605_v5 = vpop.f32.mrb[9].mxu0 }
 0x485   :  { %v374_v6 = vpop.f32.mrb[10].mxu0 }
 0x486   :  { %v1606_v8 = vpop.f32.mrb[11].mxu0  ;;  %1610 = vmatmul.mubr.msk.bf16.vlgmr.msra.gmra.mrb[8].mxu1 %vm157_vm2, %v377_v2 }
 0x487   :  { %1620 = vmatpush3.bf16.xpose.msra.mxu1 %v480_v7  ;;  %1621 = vmatprep.mubr.msk.bf16.mxu1 %vm1887_vm0, %v1886_v0 }
 0x488   :  { %1631 = vmatprep.subr.bf16.mxu1 %v1886_v0 }
 0x48e   :  { %1622 = vmatmul.mubr.msk.bf16.vlgmr.msra.gmra.mrb[12].mxu1 %vm157_vm2, %v473_v9 }
 0x48f   :  { %1633 = vmatprep.mubr.msk.bf16.mxu1 %vm1887_vm0, %v1886_v0  ;;  %1632 = vmatpush3.bf16.msra.mxu1 %v2100_v42 }
 0x490   :  { %1643 = vmatprep.subr.bf16.mxu1 %v1886_v0 }
 0x551   :  { %v466_v10 = vpop.f32.mrb[12].mxu0 }
 0x552   :  { %v1617_v11 = vpop.f32.mrb[13].mxu0 }
 0x553   :  { %v469_v12 = vpop.f32.mrb[14].mxu0 }
 0x554   :  { %v1618_v14 = vpop.f32.mrb[15].mxu0 }
 0x559   :  { %v420_v15 = vpop.f32.mrb[8].mxu1 }
 0x55a   :  { %v2078_v16 = vadd.f32 %v466_v10, %v420_v15  ;;  %v1611_v17 = vpop.f32.mrb[9].mxu1 }
 0x55b   :  { %v423_v18 = vpop.f32.mrb[10].mxu1 }
 0x55c   :  { %v1612_v20 = vpop.f32.mrb[11].mxu1 }
 0x561   :  { %v516_v21 = vpop.f32.mrb[12].mxu1 }
 0x562   :  { %v517_v22 = vadd.f32 %v2031_v19, %v516_v21  ;;  %v1623_v23 = vpop.f32.mrb[13].mxu1 }
 0x563   :  { %v519_v24 = vpop.f32.mrb[14].mxu1 }
 0x564   :  { %v1624_v25 = vpop.f32.mrb[15].mxu1  ;;  %v522_v26 = vsel %vm157_vm2, %v517_v22, -inf }
 0x565   :  { %523 = vmax.xlane.f32.xlu1 %v522_v26 }
 0x576   :  { %634 = vrot.lane.b32.xlu1 %v2009_v13, %s1894_s9 }
 0x57a   :  { %632 = vrot.lane.b32.xlu1 %v2009_v13, %s1895_s10 }
 0x5f2   :  { %v524_v27 = vpop.xlane.xlu1 %523 }
 0x5f3   :  { %v525_v28 = vsub.f32 %v517_v22, %v524_v27 }
 0x5f5   :  { %v526_v29 = vmul.f32 1.442695, %v525_v28 }
 0x5f6   :  { %v635_v37 = vpop.permute.xlu1 %634 }
 0x5f7   :  { %1757 = vpow2.f32 %v526_v29  ;;  %v640_v39 = vsel %vm157_vm2, %v635_v37, 0 }
 0x5fa   :  { %v633_v40 = vpop.permute.xlu1 %632 }
 0x601   :  { %v1758_v30 = vpop.eup %1757 }
 0x602   :  { %v528_v31 = vsel %vm157_vm2, %v1758_v30, 0.0 }
 0x603   :  { %529 = vadd.xlane.f32.xlu0 %v528_v31 }
 0x619   :  { %534 = vrot.lane.b32.xlu0 %v2009_v13, %s1896_s11 }
 0x690   :  { %v530_v32 = vpop.xlane.xlu0 %529 }
 0x691   :  { %1759 = vrcp.f32 %v530_v32 }
 0x694   :  { %v535_v33 = vpop.permute.xlu0 %534 }
 0x695   :  { %v540_v34 = vsel %vm221_vm3, %v535_v33, 0 }
 0x696   :  { %1626 = vmatpush3.bf16.msra.mxu0 %v540_v34 }
 0x697   :  { %1637 = vmatprep.subr.bf16.mxu0 %v1886_v0 }
 0x69b   :  { %v1760_v35 = vpop.eup %1759 }
 0x69c   :  { %v532_v36 = vmul.f32 %v1760_v35, %v1758_v30 }
 0x69e   :  { %v533_v38 = vpack.c.bf16 %v532_v36, %v532_v36 }
 0x6a0   :  { %1628 = vmatmul.mubr.msk.bf16.vlgmr.msra.gmra.mrb[16].mxu0 %vm157_vm2, %v533_v38 }
 0x6a1   :  { %1638 = vmatpush3.bf16.xpose.msra.mxu0 %v640_v39  ;;  %1639 = vmatprep.mubr.msk.bf16.mxu0 %vm1887_vm0, %v1886_v0 }
 0x6a2   :  { %1649 = vmatprep.subr.bf16.mxu0 %v1886_v0 }
 0x6a8   :  { %1640 = vmatmul.mubr.msk.bf16.vlgmr.msra.gmra.mrb[20].mxu0 %vm157_vm2, %v633_v40 }
 0x6a9   :  { %1651 = vmatprep.mubr.msk.bf16.mxu0 %vm1887_vm0, %v1886_v0 }
 0x773   :  { %v576_v43 = vpop.f32.mrb[16].mxu0 }
 0x774   :  { %v582_v44 = vpack.c.bf16 %v576_v43, %v576_v43  ;;  %v1629_v45 = vpop.f32.mrb[17].mxu0 }
 0x775   :  { %v579_v46 = vpop.f32.mrb[18].mxu0 }
 0x776   :  { %v1630_v47 = vpop.f32.mrb[19].mxu0  ;;  %1634 = vmatmul.mubr.msk.bf16.vlgmr.msra.gmra.mrb[16].mxu1 %vm157_vm2, %v582_v44 }
 0x777   :  { %1645 = vmatprep.mubr.msk.bf16.mxu1 %vm1887_vm0, %v1886_v0 }
 0x77b   :  { %v676_v48 = vpop.f32.mrb[20].mxu0 }
 0x77c   :  { %v677_v49 = vadd.f32 %v2031_v19, %v676_v48  ;;  %v1641_v50 = vpop.f32.mrb[21].mxu0 }
 0x77d   :  { %v679_v51 = vpop.f32.mrb[22].mxu0 }
 0x77e   :  { %v1642_v52 = vpop.f32.mrb[23].mxu0  ;;  %v682_v53 = vsel %vm157_vm2, %v677_v49, -inf }
 0x77f   :  { %683 = vmax.xlane.f32.xlu0 %v682_v53 }
 0x795   :  { %694 = vrot.lane.b32.xlu0 %v2009_v13, %s1897_s12 }
 0x799   :  { %912 = vrot.lane.b32.xlu0 %v2112_v54, %s1890_s25 }
 0x80c   :  { %v684_v56 = vpop.xlane.xlu0 %683 }
 0x80d   :  { %v685_v58 = vsub.f32 %v677_v49, %v684_v56 }
 0x80f   :  { %v686_v59 = vmul.f32 1.442695, %v685_v58 }
 0x810   :  { %v695_v19 = vpop.permute.xlu0 %694 }
 0x811   :  { %1761 = vpow2.f32 %v686_v59  ;;  %v700_v60 = vsel %vm221_vm3, %v695_v19, 0 }
 0x812   :  { %1644 = vmatpush3.bf16.msra.mxu1 %v700_v60 }
 0x813   :  { %1655 = vmatprep.subr.bf16.mxu1 %v1886_v0 }
 0x814   :  { %v913_v12 = vpop.permute.xlu0 %912 }
 0x815   :  { %v918_v14 = vsel %vm157_vm2, %v913_v12, 0 }
 0x81b   :  { %v1762_v61 = vpop.eup %1761 }
 0x81c   :  { %v688_v62 = vsel %vm157_vm2, %v1762_v61, 0.0 }
 0x81d   :  { %689 = vadd.xlane.f32.xlu1 %v688_v62 }
 0x82e   :  { %801 = vrot.lane.b32.xlu1 %v2112_v54, %s1889_s24 }
 0x832   :  { %910 = vrot.lane.b32.xlu1 %v2112_v54, %s1888_s23 }
 0x849   :  { %v625_v13 = vpop.f32.mrb[16].mxu1 }
 0x84a   :  { %v2124_v63 = vadd.f32 %v625_v13, %v2078_v16  ;;  %v1635_v1 = vpop.f32.mrb[17].mxu1  ;;  %v744_v16 = vld [vmem:[#allocation7 + $0xc] sm:$0xf] }
 0x84b   :  { %v628_v2 = vpop.f32.mrb[18].mxu1  ;;  %v2143_v17 = vsel %vm221_vm3, %v744_v16, 0 }
 0x84c   :  { %v1636_v5 = vpop.f32.mrb[19].mxu1  ;;  %1650 = vmatpush3.bf16.msra.mxu0 %v2143_v17 }
 0x84d   :  { %1661 = vmatprep.subr.bf16.mxu0 %v1886_v0 }
 0x8aa   :  { %v690_v6 = vpop.xlane.xlu1 %689 }
 0x8ab   :  { %1763 = vrcp.f32 %v690_v6 }
 0x8ae   :  { %v802_v9 = vpop.permute.xlu1 %801 }
 0x8af   :  { %v807_v11 = vsel %vm157_vm2, %v802_v9, 0 }
 0x8b2   :  { %v911_v15 = vpop.permute.xlu1 %910 }
 0x8b5   :  { %v1764_v7 = vpop.eup %1763 }
 0x8b6   :  { %v692_v8 = vmul.f32 %v1764_v7, %v1762_v61 }
 0x8b8   :  { %v693_v10 = vpack.c.bf16 %v692_v8, %v692_v8 }
 0x8ba   :  { %1646 = vmatmul.mubr.msk.bf16.vlgmr.msra.gmra.mrb[20].mxu1 %vm157_vm2, %v693_v10 }
 0x8bb   :  { %1656 = vmatpush3.bf16.xpose.msra.mxu1 %v807_v11  ;;  %1657 = vmatprep.mubr.msk.bf16.mxu1 %vm1887_vm0, %v1886_v0 }
 0x8bc   :  { %1667 = vmatprep.subr.bf16.mxu1 %v1886_v0 }
 0x8c2   :  { %1658 = vmatmul.mubr.msk.bf16.vlgmr.msra.gmra.mrb[24].mxu1 %vm157_vm2, %v2112_v54 }
 0x8c3   :  { %1668 = vmatpush3.bf16.xpose.msra.mxu1 %v918_v14  ;;  %1669 = vmatprep.mubr.msk.bf16.mxu1 %vm1887_vm0, %v1886_v0 }
 0x8c4   :  { %1679 = vmatprep.subr.bf16.mxu1 %v1886_v0 }
 0x8ca   :  { %1670 = vmatmul.mubr.msk.bf16.vlgmr.msra.gmra.mrb[28].mxu1 %vm157_vm2, %v911_v15 }
 0x8cb   :  { %1680 = vmatpush3.bf16.msra.mxu1 %v2062_v57  ;;  %1681 = vmatprep.mubr.msk.bf16.mxu1 %vm1887_vm0, %v1886_v0  ;;  %v2153_v57 = vld [vmem:[%s2265_s1 + $0x1] ss:$0 sm:$0xff] }
 0x8cc   :  { %1691 = vmatprep.subr.bf16.mxu1 %v1886_v0 }
 0x98d   :  { %v736_v18 = vpop.f32.mrb[20].mxu1 }
 0x98e   :  { %v742_v20 = vpack.c.bf16 %v736_v18, %v736_v18  ;;  %v1647_v21 = vpop.f32.mrb[21].mxu1 }
 0x98f   :  { %v739_v22 = vpop.f32.mrb[22].mxu1 }
 0x990   :  { %v1648_v23 = vpop.f32.mrb[23].mxu1  ;;  %1652 = vmatmul.mubr.msk.bf16.vlgmr.msra.gmra.mrb[24].mxu0 %vm157_vm2, %v742_v20 }
 0x991   :  { %1663 = vmatprep.mubr.msk.bf16.mxu0 %vm1887_vm0, %v1886_v0 }
 0x995   :  { %v843_v24 = vpop.f32.mrb[24].mxu1 }
 0x996   :  { %v844_v25 = vadd.f32 %v2153_v57, %v843_v24  ;;  %v1659_v26 = vpop.f32.mrb[25].mxu1 }
 0x997   :  { %v846_v27 = vpop.f32.mrb[26].mxu1 }
 0x998   :  { %v1660_v28 = vpop.f32.mrb[27].mxu1  ;;  %v849_v29 = vsel %vm157_vm2, %v844_v25, -inf }
 0x999   :  { %850 = vmax.xlane.f32.xlu0 %v849_v29 }
 0x99d   :  { %v954_v30 = vpop.f32.mrb[28].mxu1 }
 0x99e   :  { %v955_v31 = vadd.f32 %v2153_v57, %v954_v30  ;;  %v1671_v32 = vpop.f32.mrb[29].mxu1 }
 0x99f   :  { %v957_v33 = vpop.f32.mrb[30].mxu1 }
 0x9a0   :  { %v1672_v34 = vpop.f32.mrb[31].mxu1  ;;  %v960_v35 = vsel %vm157_vm2, %v955_v31, -inf }
 0x9a1   :  { %961 = vmax.xlane.f32.xlu1 %v960_v35 }
 0x9b2   :  { %861 = vrot.lane.b32.xlu1 %v2112_v54, %s1880_s15 }
 0x9b6   :  { %1109 = vrot.lane.b32.xlu1 %v2112_v54, %s1893_s30 }
 0x9ba   :  { %1107 = vrot.lane.b32.xlu1 %v2112_v54, %s1892_s29 }
 0xa26   :  { %v851_v36 = vpop.xlane.xlu0 %850 }
 0xa27   :  { %v852_v37 = vsub.f32 %v844_v25, %v851_v36 }
 0xa29   :  { %v853_v38 = vmul.f32 1.442695, %v852_v37 }
 0xa2b   :  { %1765 = vpow2.f32 %v853_v38 }
 0xa2e   :  { %v962_v39 = vpop.xlane.xlu1 %961 }
 0xa2f   :  { %v963_v40 = vsub.f32 %v955_v31, %v962_v39 }
 0xa31   :  { %v964_v41 = vmul.f32 1.442695, %v963_v40 }
 0xa32   :  { %v862_v43 = vpop.permute.xlu1 %861 }
 0xa33   :  { %1767 = vpow2.f32 %v964_v41  ;;  %v867_v44 = vsel %vm221_vm3, %v862_v43, 0 }
 0xa34   :  { %1662 = vmatpush3.bf16.msra.mxu0 %v867_v44 }
 0xa35   :  { %v1766_v45 = vpop.eup %1765  ;;  %1673 = vmatprep.subr.bf16.mxu0 %v1886_v0 }
 0xa36   :  { %v855_v46 = vsel %vm157_vm2, %v1766_v45, 0.0  ;;  %v1110_v9 = vpop.permute.xlu1 %1109 }
 0xa37   :  { %856 = vadd.xlane.f32.xlu0 %v855_v46  ;;  %v1115_v14 = vsel %vm157_vm2, %v1110_v9, 0 }
 0xa3a   :  { %v1108_v16 = vpop.permute.xlu1 %1107 }
 0xa3d   :  { %v1768_v47 = vpop.eup %1767 }
 0xa3e   :  { %v966_v48 = vsel %vm157_vm2, %v1768_v47, 0.0 }
 0xa3f   :  { %967 = vadd.xlane.f32.xlu0 %v966_v48 }
 0xa55   :  { %972 = vrot.lane.b32.xlu0 %v2112_v54, %s1891_s27 }
 0xa63   :  { %v785_v49 = vpop.f32.mrb[24].mxu0 }
 0xa64   :  { %v2172_v50 = vadd.f32 %v785_v49, %v2124_v63  ;;  %v1653_v51 = vpop.f32.mrb[25].mxu0 }
 0xa65   :  { %v788_v52 = vpop.f32.mrb[26].mxu0 }
 0xa66   :  { %v1654_v53 = vpop.f32.mrb[27].mxu0 }
 0xac4   :  { %v857_v56 = vpop.xlane.xlu0 %856 }
 0xac5   :  { %1769 = vrcp.f32 %v857_v56  ;;  %v1521_v56 = vld [vmem:[%s2269_s5] ss:$0 sm:$0xff] }
 0xacc   :  { %v968_v58 = vpop.xlane.xlu0 %967 }
 0xacd   :  { %1771 = vrcp.f32 %v968_v58  ;;  %v1423_v58 = vadd.f32 %v1521_v56, %v2172_v50 }
 0xacf   :  { %v1770_v59 = vpop.eup %1769 }
 0xad0   :  { %v859_v19 = vmul.f32 %v1770_v59, %v1766_v45  ;;  %v973_v60 = vpop.permute.xlu0 %972 }
 0xad1   :  { %v978_v62 = vsel %vm221_vm3, %v973_v60, 0 }
 0xad2   :  { %v860_v61 = vpack.c.bf16 %v859_v19, %v859_v19 }
 0xad4   :  { %1664 = vmatmul.mubr.msk.bf16.vlgmr.msra.gmra.mrb[28].mxu0 %vm157_vm2, %v860_v61 }
 0xad5   :  { %1674 = vmatpush3.bf16.msra.mxu0 %v978_v62  ;;  %1675 = vmatprep.mubr.msk.bf16.mxu0 %vm1887_vm0, %v1886_v0 }
 0xad6   :  { %1685 = vmatprep.subr.bf16.mxu0 %v1886_v0 }
 0xad7   :  { %v1772_v13 = vpop.eup %1771 }
 0xad8   :  { %v970_v63 = vmul.f32 %v1772_v13, %v1768_v47  ;;  %v1425_v13 = vadd.f32 %v1423_v58, %v1995_v3 }
 0xada   :  { %v971_v1 = vpack.c.bf16 %v970_v63, %v970_v63  ;;  %v1427_v63 = vsel %vm101_vm1, %v1425_v13, 0.0 }
 0xadc   :  { %1676 = vmatmul.mubr.msk.bf16.vlgmr.msra.gmra.mrb[32].mxu0 %vm157_vm2, %v971_v1 }
 0xadd   :  { %1686 = vmatpush3.bf16.msra.mxu0 %v2058_v55  ;;  %1687 = vmatprep.mubr.msk.bf16.mxu0 %vm1887_vm0, %v1886_v0 }
 0xade   :  { %1697 = vmatprep.subr.bf16.mxu0 %v1886_v0 }
 0xba7   :  { %v903_v2 = vpop.f32.mrb[28].mxu0 }
 0xba8   :  { %v909_v5 = vpack.c.bf16 %v903_v2, %v903_v2  ;;  %v1665_v6 = vpop.f32.mrb[29].mxu0 }
 0xba9   :  { %v906_v7 = vpop.f32.mrb[30].mxu0 }
 0xbaa   :  { %v1666_v8 = vpop.f32.mrb[31].mxu0  ;;  %1688 = vmatmul.mubr.msk.bf16.vlgmr.msra.gmra.mrb[36].mxu0 %vm157_vm2, %v909_v5 }
 0xbab   :  { %1699 = vmatprep.mubr.msk.bf16.mxu0 %vm1887_vm0, %v1886_v0 }
 0xbaf   :  { %v1014_v10 = vpop.f32.mrb[32].mxu0 }
 0xbb0   :  { %v1020_v11 = vpack.c.bf16 %v1014_v10, %v1014_v10  ;;  %v1677_v12 = vpop.f32.mrb[33].mxu0 }
 0xbb1   :  { %v1017_v55 = vpop.f32.mrb[34].mxu0 }
 0xbb2   :  { %v1678_v15 = vpop.f32.mrb[35].mxu0  ;;  %1682 = vmatmul.mubr.msk.bf16.vlgmr.msra.gmra.mrb[32].mxu1 %vm157_vm2, %v1020_v11 }
 0xbb3   :  { %1692 = vmatpush3.bf16.xpose.msra.mxu1 %v1115_v14  ;;  %1693 = vmatprep.mubr.msk.bf16.mxu1 %vm1887_vm0, %v1886_v0 }
 0xbb4   :  { %1703 = vmatprep.subr.bf16.mxu1 %v1886_v0 }
 0xbba   :  { %1694 = vmatmul.mubr.msk.bf16.vlgmr.msra.gmra.mrb[36].mxu1 %vm157_vm2, %v1108_v16 }
 0xbbb   :  { %1704 = vmatpush3.bf16.msra.mxu1 %v2100_v42  ;;  %1705 = vmatprep.mubr.msk.bf16.mxu1 %vm1887_vm0, %v1886_v0 }
 0xbbc   :  { %1715 = vmatprep.subr.bf16.mxu1 %v1886_v0 }
 0xc7d   :  { %v1101_v18 = vpop.f32.mrb[36].mxu0 }
 0xc7e   :  { %v1689_v20 = vpop.f32.mrb[37].mxu0 }
 0xc7f   :  { %v1104_v21 = vpop.f32.mrb[38].mxu0 }
 0xc80   :  { %v1690_v22 = vpop.f32.mrb[39].mxu0 }
 0xc85   :  { %v1058_v23 = vpop.f32.mrb[32].mxu1 }
 0xc86   :  { %v2197_v24 = vadd.f32 %v1101_v18, %v1058_v23  ;;  %v1683_v25 = vpop.f32.mrb[33].mxu1 }
 0xc87   :  { %v1061_v26 = vpop.f32.mrb[34].mxu1 }
 0xc88   :  { %v1684_v27 = vpop.f32.mrb[35].mxu1 }
 0xc8d   :  { %v1151_v28 = vpop.f32.mrb[36].mxu1 }
 0xc8e   :  { %v1152_v29 = vadd.f32 %v2153_v57, %v1151_v28  ;;  %v1695_v30 = vpop.f32.mrb[37].mxu1 }
 0xc8f   :  { %v1154_v42 = vpop.f32.mrb[38].mxu1 }
 0xc90   :  { %v1696_v31 = vpop.f32.mrb[39].mxu1  ;;  %v1157_v32 = vsel %vm157_vm2, %v1152_v29, -inf }
 0xc91   :  { %1158 = vmax.xlane.f32.xlu0 %v1157_v32 }
 0xca7   :  { %1169 = vrot.lane.b32.xlu0 %v2112_v54, %s1896_s11 }
 0xcab   :  { %1262 = vrot.lane.b32.xlu0 %v2112_v54, %s1895_s10 }
 0xd1e   :  { %v1159_v33 = vpop.xlane.xlu0 %1158 }
 0xd1f   :  { %v1160_v34 = vsub.f32 %v1152_v29, %v1159_v33 }
 0xd21   :  { %v1161_v35 = vmul.f32 1.442695, %v1160_v34 }
 0xd22   :  { %v1170_v36 = vpop.permute.xlu0 %1169 }
 0xd23   :  { %1773 = vpow2.f32 %v1161_v35  ;;  %v1175_v37 = vsel %vm221_vm3, %v1170_v36, 0 }
 0xd24   :  { %1698 = vmatpush3.bf16.msra.mxu0 %v1175_v37 }
 0xd25   :  { %1709 = vmatprep.subr.bf16.mxu0 %v1886_v0 }
 0xd26   :  { %v1263_v47 = vpop.permute.xlu0 %1262 }
 0xd2d   :  { %v1774_v38 = vpop.eup %1773 }
 0xd2e   :  { %v1163_v39 = vsel %vm157_vm2, %v1774_v38, 0.0 }
 0xd2f   :  { %1164 = vadd.xlane.f32.xlu1 %v1163_v39 }
 0xd40   :  { %1264 = vrot.lane.b32.xlu1 %v2112_v54, %s1894_s9 }
 0xdbc   :  { %v1165_v40 = vpop.xlane.xlu1 %1164 }
 0xdbd   :  { %1775 = vrcp.f32 %v1165_v40 }
 0xdc0   :  { %v1265_v44 = vpop.permute.xlu1 %1264 }
 0xdc1   :  { %v1270_v46 = vsel %vm157_vm2, %v1265_v44, 0  ;;  %v1523_v44 = vld [vmem:[%s2271_s7] ss:$0 sm:$0xff] }
 0xdc7   :  { %v1776_v41 = vpop.eup %1775 }
 0xdc8   :  { %v1167_v43 = vmul.f32 %v1776_v41, %v1774_v38 }
 0xdca   :  { %v1168_v45 = vpack.c.bf16 %v1167_v43, %v1167_v43 }
 0xdcc   :  { %1700 = vmatmul.mubr.msk.bf16.vlgmr.msra.gmra.mrb[40].mxu0 %vm157_vm2, %v1168_v45 }
 0xdcd   :  { %1710 = vmatpush3.bf16.xpose.msra.mxu0 %v1270_v46  ;;  %1711 = vmatprep.mubr.msk.bf16.mxu0 %vm1887_vm0, %v1886_v0 }
 0xdce   :  { %1721 = vmatprep.subr.bf16.mxu0 %v1886_v0 }
 0xdd4   :  { %1712 = vmatmul.mubr.msk.bf16.vlgmr.msra.gmra.mrb[44].mxu0 %vm157_vm2, %v1263_v47 }
 0xdd5   :  { %1722 = vmatpush3.bf16.msra.mxu0 %v2143_v17  ;;  %1723 = vmatprep.mubr.msk.bf16.mxu0 %vm1887_vm0, %v1886_v0 }
 0xe9f   :  { %v1211_v48 = vpop.f32.mrb[40].mxu0 }
 0xea0   :  { %v1217_v49 = vpack.c.bf16 %v1211_v48, %v1211_v48  ;;  %v1701_v51 = vpop.f32.mrb[41].mxu0 }
 0xea1   :  { %v1214_v52 = vpop.f32.mrb[42].mxu0 }
 0xea2   :  { %v1702_v53 = vpop.f32.mrb[43].mxu0  ;;  %1706 = vmatmul.mubr.msk.bf16.vlgmr.msra.gmra.mrb[40].mxu1 %vm157_vm2, %v1217_v49 }
 0xea3   :  { %1717 = vmatprep.mubr.msk.bf16.mxu1 %vm1887_vm0, %v1886_v0 }
 0xea7   :  { %v1306_v17 = vpop.f32.mrb[44].mxu0 }
 0xea8   :  { %v1307_v59 = vadd.f32 %v2153_v57, %v1306_v17  ;;  %v1713_v19 = vpop.f32.mrb[45].mxu0 }
 0xea9   :  { %v1309_v60 = vpop.f32.mrb[46].mxu0 }
 0xeaa   :  { %v1714_v61 = vpop.f32.mrb[47].mxu0  ;;  %v1312_v62 = vsel %vm157_vm2, %v1307_v59, -inf }
 0xeab   :  { %1313 = vmax.xlane.f32.xlu1 %v1312_v62 }
 0xeaf   :  { %1428 = vadd.xlane.f32.xlu1 %v1427_v63 }
 0xf38   :  { %v1314_v1 = vpop.xlane.xlu1 %1313 }
 0xf39   :  { %v1315_v2 = vsub.f32 %v1307_v59, %v1314_v1 }
 0xf3b   :  { %v1316_v5 = vmul.f32 1.442695, %v1315_v2 }
 0xf3c   :  { %v1429_v21 = vpop.xlane.xlu1 %1428 }
 0xf3d   :  { %1777 = vpow2.f32 %v1316_v5  ;;  %v1434_v22 = vmul.f32 0.03125, %v1429_v21 }
 0xf3f   :  { %v1436_v27 = vsub.f32 %v1425_v13, %v1434_v22 }
 0xf41   :  { %v1438_v31 = vmul.f32 %v1436_v27, %v1436_v27 }
 0xf43   :  { %v1440_v32 = vsel %vm101_vm1, %v1438_v31, 0.0 }
 0xf47   :  { %v1778_v0 = vpop.eup %1777 }
 0xf48   :  { %v1318_v50 = vsel %vm157_vm2, %v1778_v0, 0.0 }
 0xf49   :  { %1319 = vadd.xlane.f32.xlu0 %v1318_v50 }
 0xf5f   :  { %1324 = vrot.lane.b32.xlu0 %v2112_v54, %s1897_s12 }
 0xf75   :  { %v1255_v57 = vpop.f32.mrb[40].mxu1 }
 0xf76   :  { %v1261_v6 = vadd.f32 %v1255_v57, %v2197_v24  ;;  %v1707_v7 = vpop.f32.mrb[41].mxu1 }
 0xf77   :  { %v1258_v3 = vpop.f32.mrb[42].mxu1 }
 0xf78   :  { %v1708_v8 = vpop.f32.mrb[43].mxu1 }
 0xfd6   :  { %v1320_v9 = vpop.xlane.xlu0 %1319 }
 0xfd7   :  { %1779 = vrcp.f32 %v1320_v9 }
 0xfda   :  { %v1325_v10 = vpop.permute.xlu0 %1324 }
 0xfdb   :  { %v1330_v11 = vsel %vm221_vm3, %v1325_v10, 0 }
 0xfdc   :  { %1716 = vmatpush3.bf16.msra.mxu1 %v1330_v11 }
 0xfe1   :  { %v1780_v12 = vpop.eup %1779 }
 0xfe2   :  { %v1322_v55 = vmul.f32 %v1780_v12, %v1778_v0 }
 0xfe4   :  { %v1323_v14 = vpack.c.bf16 %v1322_v55, %v1322_v55 }
 0xfe6   :  { %1718 = vmatmul.mubr.msk.bf16.vlgmr.msra.gmra.mrb[44].mxu1 %vm157_vm2, %v1323_v14 }
0x10b9   :  { %v1366_v15 = vpop.f32.mrb[44].mxu1 }
0x10ba   :  { %v1372_v16 = vpack.c.bf16 %v1366_v15, %v1366_v15  ;;  %v1719_v54 = vpop.f32.mrb[45].mxu1 }
0x10bb   :  { %v1369_v18 = vpop.f32.mrb[46].mxu1 }
0x10bc   :  { %v1720_v20 = vpop.f32.mrb[47].mxu1  ;;  %1724 = vmatmul.mubr.msk.bf16.vlgmr.msra.gmra.mrb[48].mxu0 %vm157_vm2, %v1372_v16 }
0x118f   :  { %v1410_v23 = vpop.f32.mrb[48].mxu0 }
0x1190   :  { %v1416_v24 = vadd.f32 %v1410_v23, %v1261_v6  ;;  %v1725_v25 = vpop.f32.mrb[49].mxu0 }
0x1191   :  { %v1413_v26 = vpop.f32.mrb[50].mxu0 }
0x1192   :  { %v1424_v28 = vadd.f32 %v1521_v56, %v1416_v24  ;;  %v1726_v29 = vpop.f32.mrb[51].mxu0 }
0x1194   :  { %v1426_v30 = vadd.f32 %v1424_v28, %v1997_v4  ;;  %v1522_v4 = vld [vmem:[%s2270_s6] ss:$0 sm:$0xff]  ;;  %s1851_s6 = scalar_lea.vmem %s1478_s22, 256 }
0x1195   :  { %p1852_p10 = scmp.ne.s32.totalorder %s1478_s22, %s1851_s6  ;;  %p1857_p12 = scmp.lt.s32.totalorder %s1851_s6, %s1851_s6 }
0x1196   :  { %v1430_v42 = vsel %vm101_vm1, %v1426_v30, 0.0 }
0x1197   :  { %1431 = vadd.xlane.f32.xlu1 %v1430_v42  ;;  %p1858_p13 = por %p1857_p12, %p1856_p11 }
0x1199   :  { %p1859_p0 = pnand %p1858_p13, %p1852_p10 }
0x119b   :  { %1441 = vadd.xlane.f32.xlu1 %v1440_v32 }
0x1224   :  { %v1432_v33 = vpop.xlane.xlu1 %1431 }
0x1225   :  { %v1435_v34 = vmul.f32 0.03125, %v1432_v33 }
0x1227   :  { %v1437_v35 = vsub.f32 %v1426_v30, %v1435_v34 }
0x1228   :  { %v1442_v36 = vpop.xlane.xlu1 %1441 }
0x1229   :  { %v1446_v37 = vmul.f32 0.03125, %v1442_v36  ;;  %v1439_v38 = vmul.f32 %v1437_v35, %v1437_v35 }
0x122b   :  { %v1448_v39 = vadd.f32 1e-12, %v1446_v37  ;;  %v1443_v40 = vsel %vm101_vm1, %v1439_v38, 0.0 }
0x122c   :  { %1444 = vadd.xlane.f32.xlu1 %v1443_v40 }
0x122d   :  { %1781 = vrsqrt.f32 %v1448_v39 }
0x1237   :  { %v1782_v41 = vpop.eup %1781 }
0x1238   :  { %v1452_v43 = vmul.f32 %v1782_v41, %v1436_v27 }
0x123a   :  { %v1460_v45 = vmul.f32 %v1522_v4, %v1452_v43 }
0x123c   :  { %v1468_v46 = vadd.f32 %v1523_v44, %v1460_v45 }
0x123e   :  { %1470 = vst.msk [vmem:[#allocation8] sm:$0xff] %vm101_vm1, %v1468_v46 }
0x12b9   :  { %v1445_v47 = vpop.xlane.xlu1 %1444 }
0x12ba   :  { %v1447_v48 = vmul.f32 0.03125, %v1445_v47 }
0x12bc   :  { %v1449_v49 = vadd.f32 1e-12, %v1447_v48 }
0x12be   :  { %1783 = vrsqrt.f32 %v1449_v49 }
0x12c8   :  { %v1784_v51 = vpop.eup %1783 }
0x12c9   :  { %v1453_v52 = vmul.f32 %v1784_v51, %v1437_v35 }
0x12cb   :  { %v1461_v53 = vmul.f32 %v1522_v4, %v1453_v52 }
0x12cd   :  { %v1469_v56 = vadd.f32 %v1523_v44, %v1461_v53 }
0x12cf   :  { %1471 = vst.msk [vmem:[#allocation8 + $0x8] sm:$0xff] %vm101_vm1, %v1469_v56 }
0x12d0   :  { %1862 = shalt.err (!%p1859_p0)
}
0x12d1   :  { %s1863_s20 = scalar_lea.hbm %s2272_s8, 256 }
0x12d2   :  { %p1864_p1 = scmp.ne.s32.totalorder %s2272_s8, %s1863_s20  ;;  %p1867_p2 = scmp.lt.u32.totalorder %s1863_s20, %s2272_s8 }
0x12d4   :  { %p1869_p3 = pnand %p1867_p2, %p1864_p1 }
0x12d6   :  { %1872 = shalt.err (!%p1869_p3)
}
0x12d7   :  { %1483 = dma.vmem_to_hbm [thread:$0]  %s1478_s22, 256, %s2272_s8, [#allocation4], %s1883_s2, %s1883_s2, %s1884_s28  }
0x12d8   :  { %1877 = dma.done.wait [#allocation4], 256  }
0x12d9   :  { %1878 = vsyncadd [#allocation4], 4294967040 }
0x12da   :  { %1487 = vsyncpa [#allocation3], 1 }
0x12db   :  { %1488 = vsyncpa [#allocation6], 1 }
0x12dc   :  { %1489 = vsyncpa [#allocation4], 1 }

</bundles_post_ra>
